<compile_context>
chip_gen: v7x
topology: tpu7x:2x2x1
jax: 0.10.0
libtpu: 0.0.40
codegen_flags: <defaults>
</compile_context>

<pallas_src>
import functools

import jax
import jax.numpy as jnp
from jax import lax
from jax.experimental import pallas as pl
from jax.experimental.pallas import tpu as pltpu


def _encoder_kernel(traj_ref, w_in_ref, b_in_ref, w_h_ref, out_ref, gx_scr,
                    *, seq_len, b_pad, h_pad):
    """Single-program kernel: hoisted input matmul + unrolled LSTM recurrence.

    traj_ref : (S*B_pad, 2)        flattened, batch-padded trajectory
    w_in_ref : (2, 4*H_pad)        folded spatial-embedding+input weights
    b_in_ref : (1, 4*H_pad)        folded bias
    w_h_ref  : (H_pad, 4*H_pad)    recurrent weights (zero-padded)
    out_ref  : (1, B_pad, H_pad)   final hidden state (lane-dense)
    gx_scr   : (S, B_pad, 4*H_pad) VMEM scratch for precomputed input gates
    """
    # --- hoisted input-side matmul: one MXU launch for all timesteps ------
    gates_x = (jnp.dot(traj_ref[...], w_in_ref[...],
                       preferred_element_type=jnp.float32)
               + b_in_ref[...])                       # (S*B_pad, 4*H_pad)
    gx_scr[...] = gates_x.reshape(seq_len, b_pad, 4 * h_pad)

    # --- sequential recurrence (only h @ w_h is truly loop-carried) -------
    def step(t, carry):
        h, c = carry
        gates = gx_scr[t] + jnp.dot(h, w_h_ref[...],
                                    preferred_element_type=jnp.float32)
        # gate blocks start at multiples of h_pad (>=128): lane-aligned slices
        i_t = jax.nn.sigmoid(gates[:, 0 * h_pad:1 * h_pad])
        f_t = jax.nn.sigmoid(gates[:, 1 * h_pad:2 * h_pad])
        g_t = jnp.tanh(gates[:, 2 * h_pad:3 * h_pad])
        o_t = jax.nn.sigmoid(gates[:, 3 * h_pad:4 * h_pad])
        c_new = f_t * c + i_t * g_t
        h_new = o_t * jnp.tanh(c_new)
        return (h_new, c_new)

    h0 = jnp.zeros((b_pad, h_pad), jnp.float32)
    c0 = jnp.zeros((b_pad, h_pad), jnp.float32)
    h_final, _ = lax.fori_loop(0, seq_len, step, (h0, c0), unroll=True)

    out_ref[0] = h_final.astype(out_ref.dtype)


def encoder_forward(obs_traj, params):
    """obs_traj: (seq_len, batch, 2) float32 -> final_h (1, batch, h_dim)."""
    S, B, _ = obs_traj.shape
    w_emb, b_emb, w_x, w_h, b = params
    H = w_h.shape[0]

    B_pad = max(8, ((B + 7) // 8) * 8)          # f32 sublane multiple
    H_pad = max(128, ((H + 127) // 128) * 128)  # lane-aligned gate blocks

    # ---- fold spatial embedding into the LSTM input weights (exact) ------
    #   (xy @ w_emb + b_emb) @ w_x + b == xy @ (w_emb @ w_x) + (b_emb @ w_x + b)
    w_in = w_emb @ w_x                  # (2, 4H)
    b_in = b_emb @ w_x + b              # (1, 4H)

    # ---- lane-align each gate block at column offset g*H_pad -------------
    def pad_gates(m, rows_pad=None):
        rows = m.shape[0]
        out = jnp.zeros((rows if rows_pad is None else rows_pad, 4 * H_pad),
                        m.dtype)
        for g in range(4):
            out = out.at[:rows, g * H_pad:g * H_pad + H].set(
                m[:, g * H:(g + 1) * H])
        return out

    w_in_p = pad_gates(w_in)                       # (2, 4*H_pad)
    b_in_p = pad_gates(b_in)                       # (1, 4*H_pad)
    w_h_p = pad_gates(w_h, rows_pad=H_pad)         # (H_pad, 4*H_pad)

    # ---- pad batch to a sublane multiple and flatten time*batch ----------
    traj_p = jnp.zeros((S, B_pad, 2), obs_traj.dtype).at[:, :B, :].set(obs_traj)
    traj2d = traj_p.reshape(S * B_pad, 2)

    kernel = functools.partial(_encoder_kernel,
                               seq_len=S, b_pad=B_pad, h_pad=H_pad)

    grid_spec = pltpu.PrefetchScalarGridSpec(
        num_scalar_prefetch=0,
        grid=(1,),
        in_specs=[
            pl.BlockSpec((S * B_pad, 2), lambda i: (0, 0)),       # trajectory
            pl.BlockSpec((2, 4 * H_pad), lambda i: (0, 0)),       # W_in
            pl.BlockSpec((1, 4 * H_pad), lambda i: (0, 0)),       # b_in
            pl.BlockSpec((H_pad, 4 * H_pad), lambda i: (0, 0)),   # W_h
        ],
        out_specs=pl.BlockSpec((1, B_pad, H_pad), lambda i: (0, 0, 0)),
        scratch_shapes=[
            pltpu.VMEM((S, B_pad, 4 * H_pad), jnp.float32),       # gates_x
        ],
    )

    out = pl.pallas_call(
        kernel,
        out_shape=jax.ShapeDtypeStruct((1, B_pad, H_pad), jnp.float32),
        grid_spec=grid_spec,
        compiler_params=pltpu.CompilerParams(
            dimension_semantics=("arbitrary",)),
    )(traj2d, w_in_p, b_in_p, w_h_p)

    return out[:, :B, :H]


def init_params(key, embedding_dim, h_dim):
    """Deterministic synthetic parameters (shapes from the module __init__)."""
    ks = jax.random.split(key, 11)
    scale_emb = 1.0 / jnp.sqrt(2.0)
    scale_h = 1.0 / jnp.sqrt(float(h_dim))

    # spatial_embedding = nn.Linear(2, embedding_dim)
    w_emb = jax.random.uniform(ks[0], (2, embedding_dim), jnp.float32,
                               -scale_emb, scale_emb)
    b_emb = jax.random.uniform(ks[1], (1, embedding_dim), jnp.float32,
                               -scale_emb, scale_emb)

    def u(k, shape):
        return jax.random.uniform(k, shape, jnp.float32, -scale_h, scale_h)

    # TLSTM U_*, V_*, b_* stacked along gate axis in order (i, f, c, o)
    w_x = jnp.concatenate(
        [u(ks[2], (embedding_dim, h_dim)), u(ks[3], (embedding_dim, h_dim)),
         u(ks[4], (embedding_dim, h_dim)), u(ks[5], (embedding_dim, h_dim))],
        axis=1)
    w_h = jnp.concatenate(
        [u(ks[6], (h_dim, h_dim)), u(ks[7], (h_dim, h_dim)),
         u(ks[8], (h_dim, h_dim)), u(ks[9], (h_dim, h_dim))],
        axis=1)
    b = jax.random.uniform(ks[10], (1, 4 * h_dim), jnp.float32,
                           -scale_h, scale_h)
    return (w_emb, b_emb, w_x, w_h, b)


def reference_forward(obs_traj, params):
    """Plain-JAX reference with the original (unfolded) op order."""
    w_emb, b_emb, w_x, w_h, b = params
    S, B, _ = obs_traj.shape
    H = w_h.shape[0]
    x_emb = obs_traj.reshape(-1, 2) @ w_emb + b_emb
    x_emb = x_emb.reshape(S, B, -1)
    h = jnp.zeros((B, H), jnp.float32)
    c = jnp.zeros((B, H), jnp.float32)
    for t in range(S):
        gates = x_emb[t] @ w_x + h @ w_h + b
        i_t = jax.nn.sigmoid(gates[:, 0 * H:1 * H])
        f_t = jax.nn.sigmoid(gates[:, 1 * H:2 * H])
        g_t = jnp.tanh(gates[:, 2 * H:3 * H])
        o_t = jax.nn.sigmoid(gates[:, 3 * H:4 * H])
        c = f_t * c + i_t * g_t
        h = o_t * jnp.tanh(c)
    return h[None]


if __name__ == "__main__":
    SEQ_LEN = 8
    BATCH = 4
    EMBEDDING_DIM = 64
    H_DIM = 64

    key = jax.random.PRNGKey(0)
    k_x, k_p = jax.random.split(key)

    obs_traj = jax.random.normal(k_x, (SEQ_LEN, BATCH, 2), jnp.float32)
    params = init_params(k_p, EMBEDDING_DIM, H_DIM)

    final_h = encoder_forward(obs_traj, params)
    final_h = jax.block_until_ready(final_h)

    ref = reference_forward(obs_traj, params)
    assert final_h.shape == (1, BATCH, H_DIM)
    # Folding the embedding into the input weights reassociates the float
    # sums, so allow a slightly looser tolerance than bit-exact order.
    assert jnp.allclose(final_h, ref, atol=1e-4, rtol=1e-4)

    print("KERNEL_OK")
</pallas_src>

<mosaic_0001>
module attributes {stable_mosaic.version = 11 : i64} {
  func.func @_encoder_kernel(%arg0: i32, %arg1: memref<64x2xf32, #tpu.memory_space<vmem>>, %arg2: memref<2x512xf32, #tpu.memory_space<vmem>>, %arg3: memref<1x512xf32, #tpu.memory_space<vmem>>, %arg4: memref<128x512xf32, #tpu.memory_space<vmem>>, %arg5: memref<1x8x128xf32, #tpu.memory_space<vmem>>, %arg6: memref<8x8x512xf32, #tpu.memory_space<vmem>>) attributes {dimension_semantics = [#tpu.dimension_semantics<arbitrary>], iteration_bounds = array<i64: 1>, scalar_prefetch = 0 : i64, scratch_operands = 1 : i64, tpu.core_type = #tpu.core_type<tc>, window_params = [{pipeline_mode = #tpu.pipeline_mode<synchronous>, transform_indices = @transform_0, window_bounds = array<i64: 64, 2>}, {pipeline_mode = #tpu.pipeline_mode<synchronous>, transform_indices = @transform_1, window_bounds = array<i64: 2, 512>}, {pipeline_mode = #tpu.pipeline_mode<synchronous>, transform_indices = @transform_2, window_bounds = array<i64: 1, 512>}, {pipeline_mode = #tpu.pipeline_mode<synchronous>, transform_indices = @transform_3, window_bounds = array<i64: 128, 512>}, {pipeline_mode = #tpu.pipeline_mode<synchronous>, transform_indices = @transform_4, window_bounds = array<i64: 1, 8, 128>}]} {
    %c0 = arith.constant 0 : index
    %c0_0 = arith.constant 0 : index
    %0 = vector.load %arg1[%c0, %c0_0] : memref<64x2xf32, #tpu.memory_space<vmem>>, vector<64x2xf32>
    %c0_1 = arith.constant 0 : index
    %c0_2 = arith.constant 0 : index
    %1 = vector.load %arg2[%c0_1, %c0_2] : memref<2x512xf32, #tpu.memory_space<vmem>>, vector<2x512xf32>
    %cst = arith.constant dense<0.000000e+00> : vector<64x512xf32>
    %2 = tpu.matmul %0, %1, %cst {dimension_numbers = #tpu.dot_dimension_numbers<[1], [0], [0], [1], [0, 0, 1, 1], [], []>} : vector<64x2xf32>, vector<2x512xf32>, vector<64x512xf32> -> vector<64x512xf32>
    %c0_3 = arith.constant 0 : index
    %c0_4 = arith.constant 0 : index
    %3 = vector.load %arg3[%c0_3, %c0_4] : memref<1x512xf32, #tpu.memory_space<vmem>>, vector<1x512xf32>
    %4 = vector.broadcast %3 : vector<1x512xf32> to vector<64x512xf32>
    %5 = arith.addf %2, %4 : vector<64x512xf32>
    %6 = vector.shape_cast %5 : vector<64x512xf32> to vector<8x8x512xf32>
    %c0_5 = arith.constant 0 : index
    %c0_6 = arith.constant 0 : index
    %c0_7 = arith.constant 0 : index
    %7 = vector.load %arg6[%c0_5, %c0_6, %c0_7] : memref<8x8x512xf32, #tpu.memory_space<vmem>>, vector<8x8x512xf32>
    tpu.vector_store %arg6[%c0_5, %c0_6, %c0_7], %6 {strides = array<i32>} : memref<8x8x512xf32, #tpu.memory_space<vmem>>, vector<8x8x512xf32>,
    %cst_8 = arith.constant 0.000000e+00 : f32
    %8 = vector.broadcast %cst_8 : f32 to vector<8x128xf32>
    %cst_9 = arith.constant 0.000000e+00 : f32
    %9 = vector.broadcast %cst_9 : f32 to vector<8x128xf32>
    %c0_i32 = arith.constant 0 : i32
    %10 = arith.index_cast %c0_i32 : i32 to index
    %c0_10 = arith.constant 0 : index
    %c0_11 = arith.constant 0 : index
    %11 = vector.load %arg6[%10, %c0_10, %c0_11] : memref<8x8x512xf32, #tpu.memory_space<vmem>>, vector<1x8x512xf32>
    %12 = vector.shape_cast %11 : vector<1x8x512xf32> to vector<8x512xf32>
    %c0_12 = arith.constant 0 : index
    %c0_13 = arith.constant 0 : index
    %13 = vector.load %arg4[%c0_12, %c0_13] : memref<128x512xf32, #tpu.memory_space<vmem>>, vector<128x512xf32>
    %cst_14 = arith.constant dense<0.000000e+00> : vector<8x512xf32>
    %14 = tpu.matmul %8, %13, %cst_14 {dimension_numbers = #tpu.dot_dimension_numbers<[1], [0], [0], [1], [0, 0, 1, 1], [], []>} : vector<8x128xf32>, vector<128x512xf32>, vector<8x512xf32> -> vector<8x512xf32>
    %15 = arith.addf %12, %14 : vector<8x512xf32>
    %16 = vector.extract_strided_slice %15 {offsets = [0, 0], sizes = [8, 128], strides = [1, 1]} : vector<8x512xf32> to vector<8x128xf32>
    %17 = arith.negf %16 : vector<8x128xf32>
    %18 = math.exp %17 : vector<8x128xf32>
    %cst_15 = arith.constant 1.000000e+00 : f32
    %19 = vector.broadcast %cst_15 : f32 to vector<8x128xf32>
    %20 = arith.addf %19, %18 : vector<8x128xf32>
    %21 = arith.divf %19, %20 : vector<8x128xf32>
    %22 = vector.extract_strided_slice %15 {offsets = [0, 128], sizes = [8, 128], strides = [1, 1]} : vector<8x512xf32> to vector<8x128xf32>
    %23 = arith.negf %22 : vector<8x128xf32>
    %24 = math.exp %23 : vector<8x128xf32>
    %cst_16 = arith.constant 1.000000e+00 : f32
    %25 = vector.broadcast %cst_16 : f32 to vector<8x128xf32>
    %26 = arith.addf %25, %24 : vector<8x128xf32>
    %27 = arith.divf %25, %26 : vector<8x128xf32>
    %28 = vector.extract_strided_slice %15 {offsets = [0, 256], sizes = [8, 128], strides = [1, 1]} : vector<8x512xf32> to vector<8x128xf32>
    %29 = math.tanh %28 : vector<8x128xf32>
    %30 = vector.extract_strided_slice %15 {offsets = [0, 384], sizes = [8, 128], strides = [1, 1]} : vector<8x512xf32> to vector<8x128xf32>
    %31 = arith.negf %30 : vector<8x128xf32>
    %32 = math.exp %31 : vector<8x128xf32>
    %cst_17 = arith.constant 1.000000e+00 : f32
    %33 = vector.broadcast %cst_17 : f32 to vector<8x128xf32>
    %34 = arith.addf %33, %32 : vector<8x128xf32>
    %35 = arith.divf %33, %34 : vector<8x128xf32>
    %36 = arith.mulf %27, %9 : vector<8x128xf32>
    %37 = arith.mulf %21, %29 : vector<8x128xf32>
    %38 = arith.addf %36, %37 : vector<8x128xf32>
    %39 = math.tanh %38 : vector<8x128xf32>
    %40 = arith.mulf %35, %39 : vector<8x128xf32>
    %c1_i32 = arith.constant 1 : i32
    %41 = arith.index_cast %c1_i32 : i32 to index
    %c0_18 = arith.constant 0 : index
    %c0_19 = arith.constant 0 : index
    %42 = vector.load %arg6[%41, %c0_18, %c0_19] : memref<8x8x512xf32, #tpu.memory_space<vmem>>, vector<1x8x512xf32>
    %43 = vector.shape_cast %42 : vector<1x8x512xf32> to vector<8x512xf32>
    %c0_20 = arith.constant 0 : index
    %c0_21 = arith.constant 0 : index
    %44 = vector.load %arg4[%c0_20, %c0_21] : memref<128x512xf32, #tpu.memory_space<vmem>>, vector<128x512xf32>
    %cst_22 = arith.constant dense<0.000000e+00> : vector<8x512xf32>
    %45 = tpu.matmul %40, %44, %cst_22 {dimension_numbers = #tpu.dot_dimension_numbers<[1], [0], [0], [1], [0, 0, 1, 1], [], []>} : vector<8x128xf32>, vector<128x512xf32>, vector<8x512xf32> -> vector<8x512xf32>
    %46 = arith.addf %43, %45 : vector<8x512xf32>
    %47 = vector.extract_strided_slice %46 {offsets = [0, 0], sizes = [8, 128], strides = [1, 1]} : vector<8x512xf32> to vector<8x128xf32>
    %48 = arith.negf %47 : vector<8x128xf32>
    %49 = math.exp %48 : vector<8x128xf32>
    %cst_23 = arith.constant 1.000000e+00 : f32
    %50 = vector.broadcast %cst_23 : f32 to vector<8x128xf32>
    %51 = arith.addf %50, %49 : vector<8x128xf32>
    %52 = arith.divf %50, %51 : vector<8x128xf32>
    %53 = vector.extract_strided_slice %46 {offsets = [0, 128], sizes = [8, 128], strides = [1, 1]} : vector<8x512xf32> to vector<8x128xf32>
    %54 = arith.negf %53 : vector<8x128xf32>
    %55 = math.exp %54 : vector<8x128xf32>
    %cst_24 = arith.constant 1.000000e+00 : f32
    %56 = vector.broadcast %cst_24 : f32 to vector<8x128xf32>
    %57 = arith.addf %56, %55 : vector<8x128xf32>
    %58 = arith.divf %56, %57 : vector<8x128xf32>
    %59 = vector.extract_strided_slice %46 {offsets = [0, 256], sizes = [8, 128], strides = [1, 1]} : vector<8x512xf32> to vector<8x128xf32>
    %60 = math.tanh %59 : vector<8x128xf32>
    %61 = vector.extract_strided_slice %46 {offsets = [0, 384], sizes = [8, 128], strides = [1, 1]} : vector<8x512xf32> to vector<8x128xf32>
    %62 = arith.negf %61 : vector<8x128xf32>
    %63 = math.exp %62 : vector<8x128xf32>
    %cst_25 = arith.constant 1.000000e+00 : f32
    %64 = vector.broadcast %cst_25 : f32 to vector<8x128xf32>
    %65 = arith.addf %64, %63 : vector<8x128xf32>
    %66 = arith.divf %64, %65 : vector<8x128xf32>
    %67 = arith.mulf %58, %38 : vector<8x128xf32>
    %68 = arith.mulf %52, %60 : vector<8x128xf32>
    %69 = arith.addf %67, %68 : vector<8x128xf32>
    %70 = math.tanh %69 : vector<8x128xf32>
    %71 = arith.mulf %66, %70 : vector<8x128xf32>
    %c2_i32 = arith.constant 2 : i32
    %72 = arith.index_cast %c2_i32 : i32 to index
    %c0_26 = arith.constant 0 : index
    %c0_27 = arith.constant 0 : index
    %73 = vector.load %arg6[%72, %c0_26, %c0_27] : memref<8x8x512xf32, #tpu.memory_space<vmem>>, vector<1x8x512xf32>
    %74 = vector.shape_cast %73 : vector<1x8x512xf32> to vector<8x512xf32>
    %c0_28 = arith.constant 0 : index
    %c0_29 = arith.constant 0 : index
    %75 = vector.load %arg4[%c0_28, %c0_29] : memref<128x512xf32, #tpu.memory_space<vmem>>, vector<128x512xf32>
    %cst_30 = arith.constant dense<0.000000e+00> : vector<8x512xf32>
    %76 = tpu.matmul %71, %75, %cst_30 {dimension_numbers = #tpu.dot_dimension_numbers<[1], [0], [0], [1], [0, 0, 1, 1], [], []>} : vector<8x128xf32>, vector<128x512xf32>, vector<8x512xf32> -> vector<8x512xf32>
    %77 = arith.addf %74, %76 : vector<8x512xf32>
    %78 = vector.extract_strided_slice %77 {offsets = [0, 0], sizes = [8, 128], strides = [1, 1]} : vector<8x512xf32> to vector<8x128xf32>
    %79 = arith.negf %78 : vector<8x128xf32>
    %80 = math.exp %79 : vector<8x128xf32>
    %cst_31 = arith.constant 1.000000e+00 : f32
    %81 = vector.broadcast %cst_31 : f32 to vector<8x128xf32>
    %82 = arith.addf %81, %80 : vector<8x128xf32>
    %83 = arith.divf %81, %82 : vector<8x128xf32>
    %84 = vector.extract_strided_slice %77 {offsets = [0, 128], sizes = [8, 128], strides = [1, 1]} : vector<8x512xf32> to vector<8x128xf32>
    %85 = arith.negf %84 : vector<8x128xf32>
    %86 = math.exp %85 : vector<8x128xf32>
    %cst_32 = arith.constant 1.000000e+00 : f32
    %87 = vector.broadcast %cst_32 : f32 to vector<8x128xf32>
    %88 = arith.addf %87, %86 : vector<8x128xf32>
    %89 = arith.divf %87, %88 : vector<8x128xf32>
    %90 = vector.extract_strided_slice %77 {offsets = [0, 256], sizes = [8, 128], strides = [1, 1]} : vector<8x512xf32> to vector<8x128xf32>
    %91 = math.tanh %90 : vector<8x128xf32>
    %92 = vector.extract_strided_slice %77 {offsets = [0, 384], sizes = [8, 128], strides = [1, 1]} : vector<8x512xf32> to vector<8x128xf32>
    %93 = arith.negf %92 : vector<8x128xf32>
    %94 = math.exp %93 : vector<8x128xf32>
    %cst_33 = arith.constant 1.000000e+00 : f32
    %95 = vector.broadcast %cst_33 : f32 to vector<8x128xf32>
    %96 = arith.addf %95, %94 : vector<8x128xf32>
    %97 = arith.divf %95, %96 : vector<8x128xf32>
    %98 = arith.mulf %89, %69 : vector<8x128xf32>
    %99 = arith.mulf %83, %91 : vector<8x128xf32>
    %100 = arith.addf %98, %99 : vector<8x128xf32>
    %101 = math.tanh %100 : vector<8x128xf32>
    %102 = arith.mulf %97, %101 : vector<8x128xf32>
    %c3_i32 = arith.constant 3 : i32
    %103 = arith.index_cast %c3_i32 : i32 to index
    %c0_34 = arith.constant 0 : index
    %c0_35 = arith.constant 0 : index
    %104 = vector.load %arg6[%103, %c0_34, %c0_35] : memref<8x8x512xf32, #tpu.memory_space<vmem>>, vector<1x8x512xf32>
    %105 = vector.shape_cast %104 : vector<1x8x512xf32> to vector<8x512xf32>
    %c0_36 = arith.constant 0 : index
    %c0_37 = arith.constant 0 : index
    %106 = vector.load %arg4[%c0_36, %c0_37] : memref<128x512xf32, #tpu.memory_space<vmem>>, vector<128x512xf32>
    %cst_38 = arith.constant dense<0.000000e+00> : vector<8x512xf32>
    %107 = tpu.matmul %102, %106, %cst_38 {dimension_numbers = #tpu.dot_dimension_numbers<[1], [0], [0], [1], [0, 0, 1, 1], [], []>} : vector<8x128xf32>, vector<128x512xf32>, vector<8x512xf32> -> vector<8x512xf32>
    %108 = arith.addf %105, %107 : vector<8x512xf32>
    %109 = vector.extract_strided_slice %108 {offsets = [0, 0], sizes = [8, 128], strides = [1, 1]} : vector<8x512xf32> to vector<8x128xf32>
    %110 = arith.negf %109 : vector<8x128xf32>
    %111 = math.exp %110 : vector<8x128xf32>
    %cst_39 = arith.constant 1.000000e+00 : f32
    %112 = vector.broadcast %cst_39 : f32 to vector<8x128xf32>
    %113 = arith.addf %112, %111 : vector<8x128xf32>
    %114 = arith.divf %112, %113 : vector<8x128xf32>
    %115 = vector.extract_strided_slice %108 {offsets = [0, 128], sizes = [8, 128], strides = [1, 1]} : vector<8x512xf32> to vector<8x128xf32>
    %116 = arith.negf %115 : vector<8x128xf32>
    %117 = math.exp %116 : vector<8x128xf32>
    %cst_40 = arith.constant 1.000000e+00 : f32
    %118 = vector.broadcast %cst_40 : f32 to vector<8x128xf32>
    %119 = arith.addf %118, %117 : vector<8x128xf32>
    %120 = arith.divf %118, %119 : vector<8x128xf32>
    %121 = vector.extract_strided_slice %108 {offsets = [0, 256], sizes = [8, 128], strides = [1, 1]} : vector<8x512xf32> to vector<8x128xf32>
    %122 = math.tanh %121 : vector<8x128xf32>
    %123 = vector.extract_strided_slice %108 {offsets = [0, 384], sizes = [8, 128], strides = [1, 1]} : vector<8x512xf32> to vector<8x128xf32>
    %124 = arith.negf %123 : vector<8x128xf32>
    %125 = math.exp %124 : vector<8x128xf32>
    %cst_41 = arith.constant 1.000000e+00 : f32
    %126 = vector.broadcast %cst_41 : f32 to vector<8x128xf32>
    %127 = arith.addf %126, %125 : vector<8x128xf32>
    %128 = arith.divf %126, %127 : vector<8x128xf32>
    %129 = arith.mulf %120, %100 : vector<8x128xf32>
    %130 = arith.mulf %114, %122 : vector<8x128xf32>
    %131 = arith.addf %129, %130 : vector<8x128xf32>
    %132 = math.tanh %131 : vector<8x128xf32>
    %133 = arith.mulf %128, %132 : vector<8x128xf32>
    %c4_i32 = arith.constant 4 : i32
    %134 = arith.index_cast %c4_i32 : i32 to index
    %c0_42 = arith.constant 0 : index
    %c0_43 = arith.constant 0 : index
    %135 = vector.load %arg6[%134, %c0_42, %c0_43] : memref<8x8x512xf32, #tpu.memory_space<vmem>>, vector<1x8x512xf32>
    %136 = vector.shape_cast %135 : vector<1x8x512xf32> to vector<8x512xf32>
    %c0_44 = arith.constant 0 : index
    %c0_45 = arith.constant 0 : index
    %137 = vector.load %arg4[%c0_44, %c0_45] : memref<128x512xf32, #tpu.memory_space<vmem>>, vector<128x512xf32>
    %cst_46 = arith.constant dense<0.000000e+00> : vector<8x512xf32>
    %138 = tpu.matmul %133, %137, %cst_46 {dimension_numbers = #tpu.dot_dimension_numbers<[1], [0], [0], [1], [0, 0, 1, 1], [], []>} : vector<8x128xf32>, vector<128x512xf32>, vector<8x512xf32> -> vector<8x512xf32>
    %139 = arith.addf %136, %138 : vector<8x512xf32>
    %140 = vector.extract_strided_slice %139 {offsets = [0, 0], sizes = [8, 128], strides = [1, 1]} : vector<8x512xf32> to vector<8x128xf32>
    %141 = arith.negf %140 : vector<8x128xf32>
    %142 = math.exp %141 : vector<8x128xf32>
    %cst_47 = arith.constant 1.000000e+00 : f32
    %143 = vector.broadcast %cst_47 : f32 to vector<8x128xf32>
    %144 = arith.addf %143, %142 : vector<8x128xf32>
    %145 = arith.divf %143, %144 : vector<8x128xf32>
    %146 = vector.extract_strided_slice %139 {offsets = [0, 128], sizes = [8, 128], strides = [1, 1]} : vector<8x512xf32> to vector<8x128xf32>
    %147 = arith.negf %146 : vector<8x128xf32>
    %148 = math.exp %147 : vector<8x128xf32>
    %cst_48 = arith.constant 1.000000e+00 : f32
    %149 = vector.broadcast %cst_48 : f32 to vector<8x128xf32>
    %150 = arith.addf %149, %148 : vector<8x128xf32>
    %151 = arith.divf %149, %150 : vector<8x128xf32>
    %152 = vector.extract_strided_slice %139 {offsets = [0, 256], sizes = [8, 128], strides = [1, 1]} : vector<8x512xf32> to vector<8x128xf32>
    %153 = math.tanh %152 : vector<8x128xf32>
    %154 = vector.extract_strided_slice %139 {offsets = [0, 384], sizes = [8, 128], strides = [1, 1]} : vector<8x512xf32> to vector<8x128xf32>
    %155 = arith.negf %154 : vector<8x128xf32>
    %156 = math.exp %155 : vector<8x128xf32>
    %cst_49 = arith.constant 1.000000e+00 : f32
    %157 = vector.broadcast %cst_49 : f32 to vector<8x128xf32>
    %158 = arith.addf %157, %156 : vector<8x128xf32>
    %159 = arith.divf %157, %158 : vector<8x128xf32>
    %160 = arith.mulf %151, %131 : vector<8x128xf32>
    %161 = arith.mulf %145, %153 : vector<8x128xf32>
    %162 = arith.addf %160, %161 : vector<8x128xf32>
    %163 = math.tanh %162 : vector<8x128xf32>
    %164 = arith.mulf %159, %163 : vector<8x128xf32>
    %c5_i32 = arith.constant 5 : i32
    %165 = arith.index_cast %c5_i32 : i32 to index
    %c0_50 = arith.constant 0 : index
    %c0_51 = arith.constant 0 : index
    %166 = vector.load %arg6[%165, %c0_50, %c0_51] : memref<8x8x512xf32, #tpu.memory_space<vmem>>, vector<1x8x512xf32>
    %167 = vector.shape_cast %166 : vector<1x8x512xf32> to vector<8x512xf32>
    %c0_52 = arith.constant 0 : index
    %c0_53 = arith.constant 0 : index
    %168 = vector.load %arg4[%c0_52, %c0_53] : memref<128x512xf32, #tpu.memory_space<vmem>>, vector<128x512xf32>
    %cst_54 = arith.constant dense<0.000000e+00> : vector<8x512xf32>
    %169 = tpu.matmul %164, %168, %cst_54 {dimension_numbers = #tpu.dot_dimension_numbers<[1], [0], [0], [1], [0, 0, 1, 1], [], []>} : vector<8x128xf32>, vector<128x512xf32>, vector<8x512xf32> -> vector<8x512xf32>
    %170 = arith.addf %167, %169 : vector<8x512xf32>
    %171 = vector.extract_strided_slice %170 {offsets = [0, 0], sizes = [8, 128], strides = [1, 1]} : vector<8x512xf32> to vector<8x128xf32>
    %172 = arith.negf %171 : vector<8x128xf32>
    %173 = math.exp %172 : vector<8x128xf32>
    %cst_55 = arith.constant 1.000000e+00 : f32
    %174 = vector.broadcast %cst_55 : f32 to vector<8x128xf32>
    %175 = arith.addf %174, %173 : vector<8x128xf32>
    %176 = arith.divf %174, %175 : vector<8x128xf32>
    %177 = vector.extract_strided_slice %170 {offsets = [0, 128], sizes = [8, 128], strides = [1, 1]} : vector<8x512xf32> to vector<8x128xf32>
    %178 = arith.negf %177 : vector<8x128xf32>
    %179 = math.exp %178 : vector<8x128xf32>
    %cst_56 = arith.constant 1.000000e+00 : f32
    %180 = vector.broadcast %cst_56 : f32 to vector<8x128xf32>
    %181 = arith.addf %180, %179 : vector<8x128xf32>
    %182 = arith.divf %180, %181 : vector<8x128xf32>
    %183 = vector.extract_strided_slice %170 {offsets = [0, 256], sizes = [8, 128], strides = [1, 1]} : vector<8x512xf32> to vector<8x128xf32>
    %184 = math.tanh %183 : vector<8x128xf32>
    %185 = vector.extract_strided_slice %170 {offsets = [0, 384], sizes = [8, 128], strides = [1, 1]} : vector<8x512xf32> to vector<8x128xf32>
    %186 = arith.negf %185 : vector<8x128xf32>
    %187 = math.exp %186 : vector<8x128xf32>
    %cst_57 = arith.constant 1.000000e+00 : f32
    %188 = vector.broadcast %cst_57 : f32 to vector<8x128xf32>
    %189 = arith.addf %188, %187 : vector<8x128xf32>
    %190 = arith.divf %188, %189 : vector<8x128xf32>
    %191 = arith.mulf %182, %162 : vector<8x128xf32>
    %192 = arith.mulf %176, %184 : vector<8x128xf32>
    %193 = arith.addf %191, %192 : vector<8x128xf32>
    %194 = math.tanh %193 : vector<8x128xf32>
    %195 = arith.mulf %190, %194 : vector<8x128xf32>
    %c6_i32 = arith.constant 6 : i32
    %196 = arith.index_cast %c6_i32 : i32 to index
    %c0_58 = arith.constant 0 : index
    %c0_59 = arith.constant 0 : index
    %197 = vector.load %arg6[%196, %c0_58, %c0_59] : memref<8x8x512xf32, #tpu.memory_space<vmem>>, vector<1x8x512xf32>
    %198 = vector.shape_cast %197 : vector<1x8x512xf32> to vector<8x512xf32>
    %c0_60 = arith.constant 0 : index
    %c0_61 = arith.constant 0 : index
    %199 = vector.load %arg4[%c0_60, %c0_61] : memref<128x512xf32, #tpu.memory_space<vmem>>, vector<128x512xf32>
    %cst_62 = arith.constant dense<0.000000e+00> : vector<8x512xf32>
    %200 = tpu.matmul %195, %199, %cst_62 {dimension_numbers = #tpu.dot_dimension_numbers<[1], [0], [0], [1], [0, 0, 1, 1], [], []>} : vector<8x128xf32>, vector<128x512xf32>, vector<8x512xf32> -> vector<8x512xf32>
    %201 = arith.addf %198, %200 : vector<8x512xf32>
    %202 = vector.extract_strided_slice %201 {offsets = [0, 0], sizes = [8, 128], strides = [1, 1]} : vector<8x512xf32> to vector<8x128xf32>
    %203 = arith.negf %202 : vector<8x128xf32>
    %204 = math.exp %203 : vector<8x128xf32>
    %cst_63 = arith.constant 1.000000e+00 : f32
    %205 = vector.broadcast %cst_63 : f32 to vector<8x128xf32>
    %206 = arith.addf %205, %204 : vector<8x128xf32>
    %207 = arith.divf %205, %206 : vector<8x128xf32>
    %208 = vector.extract_strided_slice %201 {offsets = [0, 128], sizes = [8, 128], strides = [1, 1]} : vector<8x512xf32> to vector<8x128xf32>
    %209 = arith.negf %208 : vector<8x128xf32>
    %210 = math.exp %209 : vector<8x128xf32>
    %cst_64 = arith.constant 1.000000e+00 : f32
    %211 = vector.broadcast %cst_64 : f32 to vector<8x128xf32>
    %212 = arith.addf %211, %210 : vector<8x128xf32>
    %213 = arith.divf %211, %212 : vector<8x128xf32>
    %214 = vector.extract_strided_slice %201 {offsets = [0, 256], sizes = [8, 128], strides = [1, 1]} : vector<8x512xf32> to vector<8x128xf32>
    %215 = math.tanh %214 : vector<8x128xf32>
    %216 = vector.extract_strided_slice %201 {offsets = [0, 384], sizes = [8, 128], strides = [1, 1]} : vector<8x512xf32> to vector<8x128xf32>
    %217 = arith.negf %216 : vector<8x128xf32>
    %218 = math.exp %217 : vector<8x128xf32>
    %cst_65 = arith.constant 1.000000e+00 : f32
    %219 = vector.broadcast %cst_65 : f32 to vector<8x128xf32>
    %220 = arith.addf %219, %218 : vector<8x128xf32>
    %221 = arith.divf %219, %220 : vector<8x128xf32>
    %222 = arith.mulf %213, %193 : vector<8x128xf32>
    %223 = arith.mulf %207, %215 : vector<8x128xf32>
    %224 = arith.addf %222, %223 : vector<8x128xf32>
    %225 = math.tanh %224 : vector<8x128xf32>
    %226 = arith.mulf %221, %225 : vector<8x128xf32>
    %c7_i32 = arith.constant 7 : i32
    %227 = arith.index_cast %c7_i32 : i32 to index
    %c0_66 = arith.constant 0 : index
    %c0_67 = arith.constant 0 : index
    %228 = vector.load %arg6[%227, %c0_66, %c0_67] : memref<8x8x512xf32, #tpu.memory_space<vmem>>, vector<1x8x512xf32>
    %229 = vector.shape_cast %228 : vector<1x8x512xf32> to vector<8x512xf32>
    %c0_68 = arith.constant 0 : index
    %c0_69 = arith.constant 0 : index
    %230 = vector.load %arg4[%c0_68, %c0_69] : memref<128x512xf32, #tpu.memory_space<vmem>>, vector<128x512xf32>
    %cst_70 = arith.constant dense<0.000000e+00> : vector<8x512xf32>
    %231 = tpu.matmul %226, %230, %cst_70 {dimension_numbers = #tpu.dot_dimension_numbers<[1], [0], [0], [1], [0, 0, 1, 1], [], []>} : vector<8x128xf32>, vector<128x512xf32>, vector<8x512xf32> -> vector<8x512xf32>
    %232 = arith.addf %229, %231 : vector<8x512xf32>
    %233 = vector.extract_strided_slice %232 {offsets = [0, 0], sizes = [8, 128], strides = [1, 1]} : vector<8x512xf32> to vector<8x128xf32>
    %234 = arith.negf %233 : vector<8x128xf32>
    %235 = math.exp %234 : vector<8x128xf32>
    %cst_71 = arith.constant 1.000000e+00 : f32
    %236 = vector.broadcast %cst_71 : f32 to vector<8x128xf32>
    %237 = arith.addf %236, %235 : vector<8x128xf32>
    %238 = arith.divf %236, %237 : vector<8x128xf32>
    %239 = vector.extract_strided_slice %232 {offsets = [0, 128], sizes = [8, 128], strides = [1, 1]} : vector<8x512xf32> to vector<8x128xf32>
    %240 = arith.negf %239 : vector<8x128xf32>
    %241 = math.exp %240 : vector<8x128xf32>
    %cst_72 = arith.constant 1.000000e+00 : f32
    %242 = vector.broadcast %cst_72 : f32 to vector<8x128xf32>
    %243 = arith.addf %242, %241 : vector<8x128xf32>
    %244 = arith.divf %242, %243 : vector<8x128xf32>
    %245 = vector.extract_strided_slice %232 {offsets = [0, 256], sizes = [8, 128], strides = [1, 1]} : vector<8x512xf32> to vector<8x128xf32>
    %246 = math.tanh %245 : vector<8x128xf32>
    %247 = vector.extract_strided_slice %232 {offsets = [0, 384], sizes = [8, 128], strides = [1, 1]} : vector<8x512xf32> to vector<8x128xf32>
    %248 = arith.negf %247 : vector<8x128xf32>
    %249 = math.exp %248 : vector<8x128xf32>
    %cst_73 = arith.constant 1.000000e+00 : f32
    %250 = vector.broadcast %cst_73 : f32 to vector<8x128xf32>
    %251 = arith.addf %250, %249 : vector<8x128xf32>
    %252 = arith.divf %250, %251 : vector<8x128xf32>
    %253 = arith.mulf %244, %224 : vector<8x128xf32>
    %254 = arith.mulf %238, %246 : vector<8x128xf32>
    %255 = arith.addf %253, %254 : vector<8x128xf32>
    %256 = math.tanh %255 : vector<8x128xf32>
    %257 = arith.mulf %252, %256 : vector<8x128xf32>
    %c8_i32 = arith.constant 8 : i32
    %c0_74 = arith.constant 0 : index
    %c0_75 = arith.constant 0 : index
    %c0_76 = arith.constant 0 : index
    %258 = vector.load %arg5[%c0_74, %c0_75, %c0_76] : memref<1x8x128xf32, #tpu.memory_space<vmem>>, vector<1x8x128xf32>
    %259 = vector.shape_cast %258 : vector<1x8x128xf32> to vector<8x128xf32>
    %260 = vector.shape_cast %257 : vector<8x128xf32> to vector<1x8x128xf32>
    tpu.vector_store %arg5[%c0_74, %c0_75, %c0_76], %260 {strides = array<i32>} : memref<1x8x128xf32, #tpu.memory_space<vmem>>, vector<1x8x128xf32>,
    return
  }
  func.func @transform_0(%arg0: i32) -> (i32, i32) {
    %c0_i32 = arith.constant 0 : i32
    %c0_i32_0 = arith.constant 0 : i32
    %c0_i32_1 = arith.constant 0 : i32
    return %c0_i32, %c0_i32_0 : i32, i32
  }
  func.func @transform_1(%arg0: i32) -> (i32, i32) {
    %c0_i32 = arith.constant 0 : i32
    %c0_i32_0 = arith.constant 0 : i32
    %c0_i32_1 = arith.constant 0 : i32
    return %c0_i32, %c0_i32_0 : i32, i32
  }
  func.func @transform_2(%arg0: i32) -> (i32, i32) {
    %c0_i32 = arith.constant 0 : i32
    %c0_i32_0 = arith.constant 0 : i32
    %c0_i32_1 = arith.constant 0 : i32
    return %c0_i32, %c0_i32_0 : i32, i32
  }
  func.func @transform_3(%arg0: i32) -> (i32, i32) {
    %c0_i32 = arith.constant 0 : i32
    %c0_i32_0 = arith.constant 0 : i32
    %c0_i32_1 = arith.constant 0 : i32
    return %c0_i32, %c0_i32_0 : i32, i32
  }
  func.func @transform_4(%arg0: i32) -> (i32, i32, i32) {
    %c0_i32 = arith.constant 0 : i32
    %c0_i32_0 = arith.constant 0 : i32
    %c0_i32_1 = arith.constant 0 : i32
    %c0_i32_2 = arith.constant 0 : i32
    return %c0_i32, %c0_i32_0, %c0_i32_1 : i32, i32, i32
  }
}

</mosaic_0001>

<bundles_post_ra>
// kernel: tpu_custom_call.1
= control target key start
LH: loop header
LB: loop body
LE: loop exit
PB: predicated region body
PF: predicated region fallthrough
CT: control target
= control target key end

     0   :  { %9 = vsyncpa [#allocation4], 0  ;;  %s3185_s0 = inlined_call_operand.vmem [shape: f32[64,2], index: 0, kind: input, shape index: {}]   ;;  %s3186_s1 = inlined_call_operand.vmem [shape: f32[2,512], index: 1, kind: input, shape index: {}]   ;;  %s3187_s2 = inlined_call_operand.vmem [shape: f32[1,512], index: 2, kind: input, shape index: {}]   ;;  %s3188_s3 = inlined_call_operand.hbm [shape: f32[128,512], index: 3, kind: input, shape index: {}]   ;;  %s3189_s4 = inlined_call_operand.hbm [shape: f32[1,8,128], index: 4, kind: output, shape index: {}]  }
   0x1   :  { %10 = vsyncpa [#allocation5], 0  ;;  %s2655_s15 = smov [#allocation3]   ;;  %s2607_s19 = scalar_lea.hbm %s3188_s3, 8192 }
   0x2   :  { %s22_s16 = sshll.u32 %s2655_s15, 4  ;;  %p2608_p0 = scmp.ne.s32.totalorder %s3188_s3, %s2607_s19  ;;  %s23_s16 = int_to_ptr.vmem [resolvable:$true] %s22_s16 }
   0x3   :  { %p2611_p1 = scmp.lt.u32.totalorder %s2607_s19, %s3188_s3 }
   0x5   :  { %p2613_p2 = pnand %p2611_p1, %p2608_p0 }
   0x7   :  { %2616 = shalt.err (!%p2613_p2)
}
   0x8   :  { %s2617_s24 = scalar_lea.vmem %s23_s16, 8192  ;;  %p2622_p4 = scmp.lt.s32.totalorder %s23_s16, %s23_s16 }
   0x9   :  { %p2618_p3 = scmp.ne.s32.totalorder %s23_s16, %s2617_s24  ;;  %p2623_p5 = scmp.lt.s32.totalorder %s2617_s24, %s2617_s24 }
   0xb   :  { %p2624_p6 = por %p2623_p5, %p2622_p4 }
   0xd   :  { %p2625_p7 = pnand %p2624_p6, %p2618_p3 }
   0xf   :  { %2628 = shalt.err (!%p2625_p7)
}
  0x10   :  { %s2656_s25 = smov 512   ;;  %s2657_s26 = smov 32  }
  0x11   :  { %28 = dma.hbm_to_vmem [thread:$0]  %s3188_s3, 8192, %s23_s16, [#allocation4], %s2656_s25, %s2656_s25, %s2657_s26  }
  0x12   :  { %2651 = dma.done.wait [#allocation4], 8192  }
  0x13   :  { %2652 = vsyncadd [#allocation4], 4294959104  ;;  %v43_v0 = vlaneseq  ;;  %v2658_v1 = vmov 1983009808   ;;  %v2659_v3 = vmov 0.0   ;;  %v40_v7 = vld [vmem:[%s3186_s1] sm:$0xff] }
  0x14   :  { %v66_v2 = vunpack.c.l.s4 %v2658_v1  ;;  %179 = vmatprep.mubr.f32.mxu0 %v2659_v3  ;;  %292 = vmatprep.mubr.f32.mxu1 %v2659_v3  ;;  %v64_v9 = vcombine.high %v40_v7, %v40_v7  ;;  %v378_v10 = vld [vmem:[#allocation3 + $0x8] sm:$0xff]  ;;  %vm106_vm0 = vcmask 1041408   ;;  %v377_v12 = vld [vmem:[#allocation3] sm:$0xff]  ;;  %v380_v16 = vld [vmem:[#allocation3 + $0x18] sm:$0xff]  ;;  %vm81_vm1 = vcmask 15360  }
  0x15   :  { %v2700_v4 = vshrl.u32 %v43_v0, 7  ;;  %v382_v11 = vld [vmem:[#allocation3 + $0x28] sm:$0xff]  ;;  %v381_v13 = vld [vmem:[#allocation3 + $0x20] sm:$0xff]  ;;  %v384_v17 = vld [vmem:[#allocation3 + $0x38] sm:$0xff] }
  0x16   :  { %v67_v5 = vunpack.c.0.s8 %v66_v2  ;;  %v32_v18 = vld [vmem:[%s3185_s0] sm:$0xff]  ;;  %v2709_v19 = vpack.c.bf16 %v382_v11, %v378_v10  ;;  %v2712_v23 = vpack.c.bf16 %v381_v13, %v377_v12  ;;  %v386_v24 = vld [vmem:[#allocation3 + $0x48] sm:$0xff]  ;;  %v2715_v26 = vpack.c.bf16 %v384_v17, %v380_v16  ;;  %v385_v27 = vld [vmem:[#allocation3 + $0x40] sm:$0xff] }
  0x17   :  { %v379_v20 = vld [vmem:[#allocation3 + $0x10] sm:$0xff]  ;;  %v390_v25 = vld [vmem:[#allocation3 + $0x68] sm:$0xff]  ;;  %v389_v28 = vld [vmem:[#allocation3 + $0x60] sm:$0xff] }
  0x18   :  { %v70_v6 = vsub.s32 %v67_v5, %v2700_v4  ;;  %v383_v21 = vld [vmem:[#allocation3 + $0x30] sm:$0xff]  ;;  %v388_v30 = vld [vmem:[#allocation3 + $0x58] sm:$0xff]  ;;  %v2726_v33 = vpack.c.bf16 %v390_v25, %v386_v24  ;;  %v2730_v36 = vpack.c.bf16 %v389_v28, %v385_v27  ;;  %v394_v37 = vld [vmem:[#allocation3 + $0x88] sm:$0xff] }
  0x19   :  { %v2719_v29 = vpack.c.bf16 %v383_v21, %v379_v20  ;;  %v392_v31 = vld [vmem:[#allocation3 + $0x78] sm:$0xff]  ;;  %v387_v34 = vld [vmem:[#allocation3 + $0x50] sm:$0xff]  ;;  %v398_v38 = vld [vmem:[#allocation3 + $0xa8] sm:$0xff] }
  0x1a   :  { %v71_v8 = vrot.slane %v40_v7, %v70_v6  ;;  %v78_v15 = vrot.slane %v64_v9, %v70_v6  ;;  %v33_v32 = vld [vmem:[%s3185_s0 + $0x8] sm:$0xff]  ;;  %v391_v35 = vld [vmem:[#allocation3 + $0x70] sm:$0xff]  ;;  %v2734_v39 = vpack.c.bf16 %v392_v31, %v388_v30  ;;  %v393_v40 = vld [vmem:[#allocation3 + $0x80] sm:$0xff]  ;;  %v2745_v46 = vpack.c.bf16 %v398_v38, %v394_v37 }
  0x1b   :  { %v397_v41 = vld [vmem:[#allocation3 + $0xa0] sm:$0xff]  ;;  %v2738_v42 = vpack.c.bf16 %v391_v35, %v387_v34  ;;  %v396_v43 = vld [vmem:[#allocation3 + $0x98] sm:$0xff]  ;;  %v395_v47 = vld [vmem:[#allocation3 + $0x90] sm:$0xff] }
  0x1c   :  { %v79_v14 = vcombine.high %v71_v8, %v71_v8  ;;  %v80_v22 = vcombine.high %v78_v15, %v78_v15  ;;  %v400_v44 = vld [vmem:[#allocation3 + $0xb8] sm:$0xff]  ;;  %v34_v45 = vld [vmem:[%s3185_s0 + $0x10] sm:$0xff]  ;;  %v399_v48 = vld [vmem:[#allocation3 + $0xb0] sm:$0xff]  ;;  %v2749_v49 = vpack.c.bf16 %v397_v41, %v393_v40 }
  0x1d   :  { %v402_v50 = vld [vmem:[#allocation3 + $0xc8] sm:$0xff]  ;;  %v2753_v52 = vpack.c.bf16 %v400_v44, %v396_v43  ;;  %v401_v53 = vld [vmem:[#allocation3 + $0xc0] sm:$0xff]  ;;  %v2757_v55 = vpack.c.bf16 %v399_v48, %v395_v47  ;;  %v404_v56 = vld [vmem:[#allocation3 + $0xd8] sm:$0xff] }
  0x1e   :  { %1852 = vmatprep.subr.msk.mxu0 %vm106_vm0, %v79_v14  ;;  %1862 = vmatprep.subr.msk.mxu1 %vm106_vm0, %v80_v22  ;;  %v406_v51 = vld [vmem:[#allocation3 + $0xe8] sm:$0xff]  ;;  %v405_v54 = vld [vmem:[#allocation3 + $0xe0] sm:$0xff]  ;;  %v408_v57 = vld [vmem:[#allocation3 + $0xf8] sm:$0xff] }
  0x1f   :  { %1853 = vmatpush1.msk.msra.mxu0 %vm106_vm0, %v71_v8  ;;  %1863 = vmatpush1.msk.msra.mxu1 %vm106_vm0, %v78_v15  ;;  %v35_v58 = vld [vmem:[%s3185_s0 + $0x18] sm:$0xff]  ;;  %v2764_v59 = vpack.c.bf16 %v406_v51, %v402_v50  ;;  %v403_v60 = vld [vmem:[#allocation3 + $0xd0] sm:$0xff]  ;;  %v2768_v62 = vpack.c.bf16 %v405_v54, %v401_v53  ;;  %v2772_v1 = vpack.c.bf16 %v408_v57, %v404_v56  ;;  %v409_v2 = vld [vmem:[#allocation3 + $0x100] sm:$0xff] }
  0x20   :  { %1854 = vmatmul.mubr.msk.f32.vlgmr.msra.gmra.mrb[0].mxu0 %vm81_vm1, %v32_v18  ;;  %1897 = vmatprep.subr.bf16.mxu0 %v2709_v19  ;;  %v407_v61 = vld [vmem:[#allocation3 + $0xf0] sm:$0xff]  ;;  %v410_v63 = vld [vmem:[#allocation3 + $0x108] sm:$0xff]  ;;  %v413_v5 = vld [vmem:[#allocation3 + $0x120] sm:$0xff] }
  0x21   :  { %1899 = vmatpush1.bf16.msra.mxu0 %v2712_v23  ;;  %1864 = vmatmul.mubr.msk.f32.vlgmr.msra.gmra.mrb[0].mxu1 %vm81_vm1, %v32_v18  ;;  %v414_v0 = vld [vmem:[#allocation3 + $0x128] sm:$0xff]  ;;  %v2776_v6 = vpack.c.bf16 %v407_v61, %v403_v60  ;;  %v412_v7 = vld [vmem:[#allocation3 + $0x118] sm:$0xff]  ;;  %v36_v9 = vld [vmem:[%s3185_s0 + $0x20] sm:$0xff]  ;;  %v2787_v13 = vpack.c.bf16 %v413_v5, %v409_v2 }
  0x22   :  { %1929 = vmatprep.subr.bf16.mxu1 %v2715_v26  ;;  %185 = vmatprep.mubr.f32.mxu0 %v2659_v3  ;;  %v416_v8 = vld [vmem:[#allocation3 + $0x138] sm:$0xff]  ;;  %v2783_v10 = vpack.c.bf16 %v414_v0, %v410_v63  ;;  %v411_v11 = vld [vmem:[#allocation3 + $0x110] sm:$0xff]  ;;  %v418_v14 = vld [vmem:[#allocation3 + $0x148] sm:$0xff] }
  0x23   :  { %1931 = vmatpush1.bf16.msra.mxu1 %v2719_v29  ;;  %1901 = vmatprep.subr.bf16.mxu0 %v2726_v33  ;;  %v415_v12 = vld [vmem:[#allocation3 + $0x130] sm:$0xff]  ;;  %v422_v15 = vld [vmem:[#allocation3 + $0x168] sm:$0xff]  ;;  %v2791_v16 = vpack.c.bf16 %v416_v8, %v412_v7  ;;  %v417_v17 = vld [vmem:[#allocation3 + $0x140] sm:$0xff] }
  0x24   :  { %1855 = vmatmul.mubr.msk.f32.gmra.mrb[2].mxu0 %vm81_vm1, %v33_v32  ;;  %298 = vmatprep.mubr.f32.mxu1 %v2659_v3  ;;  %v421_v18 = vld [vmem:[#allocation3 + $0x160] sm:$0xff]  ;;  %v2795_v20 = vpack.c.bf16 %v415_v12, %v411_v11  ;;  %v420_v21 = vld [vmem:[#allocation3 + $0x158] sm:$0xff]  ;;  %v2802_v25 = vpack.c.bf16 %v422_v15, %v418_v14  ;;  %v419_v27 = vld [vmem:[#allocation3 + $0x150] sm:$0xff]  ;;  %v49_v11 = vsub.s32 1, %v2700_v4 }
  0x25   :  { %1903 = vmatpush1.bf16.msra.mxu0 %v2730_v36  ;;  %1865 = vmatmul.mubr.msk.f32.gmra.mrb[2].mxu1 %vm81_vm1, %v33_v32  ;;  %v424_v22 = vld [vmem:[#allocation3 + $0x178] sm:$0xff]  ;;  %v423_v28 = vld [vmem:[#allocation3 + $0x170] sm:$0xff]  ;;  %v2806_v30 = vpack.c.bf16 %v421_v18, %v417_v17  ;;  %v426_v31 = vld [vmem:[#allocation3 + $0x188] sm:$0xff]  ;;  %v57_v17 = vsub.s32 3, %v2700_v4 }
  0x26   :  { %1933 = vmatprep.subr.bf16.mxu1 %v2734_v39  ;;  %191 = vmatprep.mubr.f32.mxu0 %v2659_v3  ;;  %v37_v24 = vld [vmem:[%s3185_s0 + $0x28] sm:$0xff]  ;;  %v430_v32 = vld [vmem:[#allocation3 + $0x1a8] sm:$0xff]  ;;  %v2810_v34 = vpack.c.bf16 %v424_v22, %v420_v21  ;;  %v425_v35 = vld [vmem:[#allocation3 + $0x180] sm:$0xff]  ;;  %v2814_v38 = vpack.c.bf16 %v423_v28, %v419_v27 }
  0x27   :  { %1935 = vmatpush1.bf16.msra.mxu1 %v2738_v42  ;;  %1905 = vmatprep.subr.bf16.mxu0 %v2745_v46  ;;  %v429_v37 = vld [vmem:[#allocation3 + $0x1a0] sm:$0xff]  ;;  %v428_v40 = vld [vmem:[#allocation3 + $0x198] sm:$0xff]  ;;  %v2821_v44 = vpack.c.bf16 %v430_v32, %v426_v31  ;;  %v431_v47 = vld [vmem:[#allocation3 + $0x1b0] sm:$0xff] }
  0x28   :  { %1856 = vmatmul.mubr.msk.f32.gmra.mrb[4].mxu0 %vm81_vm1, %v34_v45  ;;  %304 = vmatprep.mubr.f32.mxu1 %v2659_v3  ;;  %v432_v41 = vld [vmem:[#allocation3 + $0x1b8] sm:$0xff]  ;;  %v38_v43 = vld [vmem:[%s3185_s0 + $0x30] sm:$0xff]  ;;  %v2825_v48 = vpack.c.bf16 %v429_v37, %v425_v35  ;;  %v434_v50 = vld [vmem:[#allocation3 + $0x1c8] sm:$0xff]  ;;  %v53_v37 = vsub.s32 2, %v2700_v4 }
  0x29   :  { %1907 = vmatpush1.bf16.msra.mxu0 %v2749_v49  ;;  %1866 = vmatmul.mubr.msk.f32.gmra.mrb[4].mxu1 %vm81_vm1, %v34_v45  ;;  %v427_v45 = vld [vmem:[#allocation3 + $0x190] sm:$0xff]  ;;  %v438_v51 = vld [vmem:[#allocation3 + $0x1e8] sm:$0xff]  ;;  %v2829_v53 = vpack.c.bf16 %v432_v41, %v428_v40  ;;  %v433_v54 = vld [vmem:[#allocation3 + $0x1c0] sm:$0xff] }
  0x2a   :  { %1937 = vmatprep.subr.bf16.mxu1 %v2753_v52  ;;  %197 = vmatprep.mubr.f32.mxu0 %v2659_v3  ;;  %v437_v56 = vld [vmem:[#allocation3 + $0x1e0] sm:$0xff]  ;;  %v2833_v57 = vpack.c.bf16 %v431_v47, %v427_v45  ;;  %v440_v60 = vld [vmem:[#allocation3 + $0x1f8] sm:$0xff]  ;;  %v39_v61 = vld [vmem:[%s3185_s0 + $0x38] sm:$0xff]  ;;  %v2840_v63 = vpack.c.bf16 %v438_v51, %v434_v50 }
  0x2b   :  { %1939 = vmatpush1.bf16.msra.mxu1 %v2757_v55  ;;  %1909 = vmatprep.subr.bf16.mxu0 %v2764_v59  ;;  %v435_v0 = vld [vmem:[#allocation3 + $0x1d0] sm:$0xff]  ;;  %v2844_v5 = vpack.c.bf16 %v437_v56, %v433_v54 }
  0x2c   :  { %1857 = vmatmul.mubr.msk.f32.gmra.mrb[6].mxu0 %vm81_vm1, %v35_v58  ;;  %310 = vmatprep.mubr.f32.mxu1 %v2659_v3  ;;  %v439_v2 = vld [vmem:[#allocation3 + $0x1f0] sm:$0xff] }
  0x2d   :  { %1911 = vmatpush1.bf16.msra.mxu0 %v2768_v62  ;;  %1867 = vmatmul.mubr.msk.f32.gmra.mrb[6].mxu1 %vm81_vm1, %v35_v58  ;;  %v436_v58 = vld [vmem:[#allocation3 + $0x1d8] sm:$0xff]  ;;  %v2852_v8 = vpack.c.bf16 %v439_v2, %v435_v0  ;;  %v41_v12 = vld [vmem:[%s3187_s2] sm:$0xf]  ;;  %s2660_s2 = smov [#allocation6]  }
  0x2e   :  { %1941 = vmatprep.subr.bf16.mxu1 %v2772_v1  ;;  %203 = vmatprep.mubr.f32.mxu0 %v2659_v3  ;;  %v2848_v7 = vpack.c.bf16 %v440_v60, %v436_v58  ;;  %v2907_v15 = vrot.slane %v41_v12, %v49_v11  ;;  %v2912_v35 = vrot.slane %v41_v12, %v57_v17  ;;  %s1843_s20 = sshll.u32 %s2660_s2, 4  ;;  %s1844_s20 = int_to_ptr.vmem [resolvable:$true] %s1843_s20 }
  0x2f   :  { %1943 = vmatpush1.bf16.msra.mxu1 %v2776_v6  ;;  %1913 = vmatprep.subr.bf16.mxu0 %v2783_v10  ;;  %v2916_v41 = vrot.slane %v41_v12, %v53_v37  ;;  %s2629_s21 = scalar_lea.vmem %s1844_s20, 128  ;;  %p2634_p9 = scmp.lt.s32.totalorder %s1844_s20, %s1844_s20 }
  0x30   :  { %1858 = vmatmul.mubr.msk.f32.gmra.mrb[8].mxu0 %vm81_vm1, %v36_v9  ;;  %316 = vmatprep.mubr.f32.mxu1 %v2659_v3  ;;  %p2630_p8 = scmp.ne.s32.totalorder %s1844_s20, %s2629_s21  ;;  %p2635_p10 = scmp.lt.s32.totalorder %s2629_s21, %s2629_s21 }
  0x31   :  { %1915 = vmatpush1.bf16.msra.mxu0 %v2787_v13  ;;  %1868 = vmatmul.mubr.msk.f32.gmra.mrb[8].mxu1 %vm81_vm1, %v36_v9  ;;  %v45_v9 = vsub.s32 0, %v2700_v4 }
  0x32   :  { %1945 = vmatprep.subr.bf16.mxu1 %v2791_v16  ;;  %209 = vmatprep.mubr.f32.mxu0 %v2659_v3  ;;  %p2636_p11 = por %p2635_p10, %p2634_p9 }
  0x33   :  { %1947 = vmatpush1.bf16.msra.mxu1 %v2795_v20  ;;  %1917 = vmatprep.subr.bf16.mxu0 %v2802_v25  ;;  %v2905_v14 = vrot.slane %v41_v12, %v45_v9 }
  0x34   :  { %1859 = vmatmul.mubr.msk.f32.gmra.mrb[10].mxu0 %vm81_vm1, %v37_v24  ;;  %322 = vmatprep.mubr.f32.mxu1 %v2659_v3  ;;  %p2637_p12 = pnand %p2636_p11, %p2630_p8 }
  0x35   :  { %1919 = vmatpush1.bf16.msra.mxu0 %v2806_v30  ;;  %1869 = vmatmul.mubr.msk.f32.gmra.mrb[10].mxu1 %vm81_vm1, %v37_v24 }
  0x36   :  { %1949 = vmatprep.subr.bf16.mxu1 %v2810_v34  ;;  %215 = vmatprep.mubr.f32.mxu0 %v2659_v3 }
  0x37   :  { %1951 = vmatpush1.bf16.msra.mxu1 %v2814_v38  ;;  %1921 = vmatprep.subr.bf16.mxu0 %v2821_v44 }
  0x38   :  { %1860 = vmatmul.mubr.msk.f32.gmra.mrb[12].mxu0 %vm81_vm1, %v38_v43  ;;  %328 = vmatprep.mubr.f32.mxu1 %v2659_v3 }
  0x39   :  { %1923 = vmatpush1.bf16.msra.mxu0 %v2825_v48  ;;  %1870 = vmatmul.mubr.msk.f32.gmra.mrb[12].mxu1 %vm81_vm1, %v38_v43 }
  0x3a   :  { %1953 = vmatprep.subr.bf16.mxu1 %v2829_v53  ;;  %221 = vmatprep.mubr.f32.mxu0 %v2659_v3 }
  0x3b   :  { %1955 = vmatpush1.bf16.msra.mxu1 %v2833_v57  ;;  %1925 = vmatprep.subr.bf16.mxu0 %v2840_v63 }
  0x3c   :  { %1861 = vmatmul.mubr.msk.f32.gmra.mrb[14].mxu0 %vm81_vm1, %v39_v61  ;;  %334 = vmatprep.mubr.f32.mxu1 %v2659_v3 }
  0x3d   :  { %1927 = vmatpush1.bf16.msra.mxu0 %v2844_v5  ;;  %1871 = vmatmul.mubr.msk.f32.gmra.mrb[14].mxu1 %vm81_vm1, %v39_v61 }
  0x3e   :  { %1957 = vmatprep.subr.bf16.mxu1 %v2848_v7  ;;  %505 = vmatprep.mubr.f32.mxu0 %v2659_v3 }
  0x3f   :  { %1959 = vmatpush1.bf16.msra.mxu1 %v2852_v8  ;;  %576 = vmatprep.mubr.f32.mxu1 %v2659_v3 }
  0x40   :  { %506 = vmatmul.mubr.f32.vlgmr.msra.gmra.mrb[0].mxu0 %v2659_v3  ;;  %1961 = vmatprep.subr.bf16.mxu0 %v2709_v19 }
  0x41   :  { %1993 = vmatprep.subr.bf16.mxu1 %v2715_v26  ;;  %1963 = vmatpush1.bf16.msra.mxu0 %v2712_v23 }
  0x42   :  { %577 = vmatmul.mubr.f32.vlgmr.msra.gmra.mrb[0].mxu1 %v2659_v3  ;;  %1965 = vmatprep.subr.bf16.mxu0 %v2726_v33 }
  0x43   :  { %1995 = vmatpush1.bf16.msra.mxu1 %v2719_v29  ;;  %680 = vmatprep.mubr.f32.mxu0 %v2659_v3 }
  0x44   :  { %1997 = vmatprep.subr.bf16.mxu1 %v2734_v39  ;;  %751 = vmatprep.mubr.f32.mxu1 %v2659_v3 }
  0x45   :  { %1967 = vmatpush1.bf16.msra.mxu0 %v2730_v36 }
  0x46   :  { %1969 = vmatprep.subr.bf16.mxu0 %v2745_v46 }
  0x47   :  { %1999 = vmatpush1.bf16.msra.mxu1 %v2738_v42 }
  0x48   :  { %2001 = vmatprep.subr.bf16.mxu1 %v2753_v52 }
  0x49   :  { %1971 = vmatpush1.bf16.msra.mxu0 %v2749_v49 }
  0x4a   :  { %1973 = vmatprep.subr.bf16.mxu0 %v2764_v59 }
  0x4b   :  { %2003 = vmatpush1.bf16.msra.mxu1 %v2757_v55 }
  0x4c   :  { %2005 = vmatprep.subr.bf16.mxu1 %v2772_v1 }
  0x4d   :  { %1975 = vmatpush1.bf16.msra.mxu0 %v2768_v62 }
  0x4e   :  { %1977 = vmatprep.subr.bf16.mxu0 %v2783_v10 }
  0x4f   :  { %2007 = vmatpush1.bf16.msra.mxu1 %v2776_v6 }
  0x50   :  { %2009 = vmatprep.subr.bf16.mxu1 %v2791_v16 }
  0x51   :  { %1979 = vmatpush1.bf16.msra.mxu0 %v2787_v13 }
  0x52   :  { %1981 = vmatprep.subr.bf16.mxu0 %v2802_v25 }
  0x53   :  { %2011 = vmatpush1.bf16.msra.mxu1 %v2795_v20 }
  0x54   :  { %2013 = vmatprep.subr.bf16.mxu1 %v2810_v34 }
  0x55   :  { %1983 = vmatpush1.bf16.msra.mxu0 %v2806_v30 }
  0x56   :  { %1985 = vmatprep.subr.bf16.mxu0 %v2821_v44 }
  0x57   :  { %2015 = vmatpush1.bf16.msra.mxu1 %v2814_v38 }
  0x58   :  { %2017 = vmatprep.subr.bf16.mxu1 %v2829_v53 }
  0x59   :  { %1987 = vmatpush1.bf16.msra.mxu0 %v2825_v48 }
  0x5a   :  { %1989 = vmatprep.subr.bf16.mxu0 %v2840_v63 }
  0x5b   :  { %2019 = vmatpush1.bf16.msra.mxu1 %v2833_v57 }
  0x5c   :  { %2021 = vmatprep.subr.bf16.mxu1 %v2848_v7 }
  0x5d   :  { %1991 = vmatpush1.bf16.msra.mxu0 %v2844_v5 }
  0x5e   :  { %2025 = vmatprep.subr.bf16.mxu0 %v2709_v19 }
  0x5f   :  { %2023 = vmatpush1.bf16.msra.mxu1 %v2852_v8 }
  0x60   :  { %2057 = vmatprep.subr.bf16.mxu1 %v2715_v26 }
 0x113   :  { %v507_v18 = vpop.f32.mrb[0].mxu0 }
 0x114   :  { %v2408_v21 = vadd.f32 %v507_v18, %v2905_v14  ;;  %v509_v22 = vpop.f32.mrb[1].mxu0 }
 0x115   :  { %v2409_v24 = vadd.f32 %v509_v22, %v2907_v15  ;;  %v578_v27 = vpop.f32.mrb[0].mxu1 }
 0x116   :  { %v1872_v28 = vmul.f32 -1.442695, %v2408_v21  ;;  %v580_v31 = vpop.f32.mrb[1].mxu1  ;;  %v2424_v45 = vadd.f32 %v578_v27, %v2916_v41 }
 0x117   :  { %v1873_v32 = vmul.f32 -1.442695, %v2409_v24  ;;  %v2425_v40 = vadd.f32 %v580_v31, %v2912_v35 }
 0x118   :  { %2479 = vpow2.f32 %v1872_v28 }
 0x119   :  { %2481 = vpow2.f32 %v1873_v32  ;;  %v1874_v43 = vmul.f32 -1.442695, %v2425_v40 }
 0x11b   :  { %2483 = vpow2.f32 %v1874_v43 }
 0x11c   :  { %2485 = vtanh.f32 %v2424_v45 }
 0x122   :  { %v2480_v47 = vpop.eup %2479 }
 0x123   :  { %v2482_v50 = vpop.eup %2481  ;;  %v590_v51 = vadd.f32 1.0, %v2480_v47 }
 0x124   :  { %v596_v54 = vadd.f32 1.0, %v2482_v50 }
 0x125   :  { %2487 = vrcp.f32 %v590_v51  ;;  %v2484_v56 = vpop.eup %2483 }
 0x126   :  { %2489 = vrcp.f32 %v596_v54  ;;  %v2486_v58 = vpop.eup %2485  ;;  %v603_v0 = vadd.f32 1.0, %v2484_v56 }
 0x128   :  { %2491 = vrcp.f32 %v603_v0 }
 0x12f   :  { %v2488_v4 = vpop.eup %2487 }
 0x130   :  { %v2490_v60 = vpop.eup %2489  ;;  %v607_v61 = vmul.f32 %v2488_v4, %v2486_v58 }
 0x131   :  { %v606_v2 = vmul.f32 0.0, %v2490_v60 }
 0x132   :  { %v2492_v11 = vpop.eup %2491 }
 0x133   :  { %v2919_v9 = vadd.f32 %v607_v61, %v606_v2 }
 0x135   :  { %2493 = vtanh.f32 %v2919_v9 }
 0x13f   :  { %v2494_v12 = vpop.eup %2493 }
 0x140   :  { %v610_v17 = vmul.f32 %v2494_v12, %v2492_v11 }
 0x142   :  { %681 = vmatmul.mubr.f32.vlgmr.msra.gmra.mrb[2].mxu0 %v610_v17  ;;  %752 = vmatmul.mubr.f32.vlgmr.msra.gmra.mrb[2].mxu1 %v610_v17 }
 0x143   :  { %2027 = vmatpush1.bf16.msra.mxu0 %v2712_v23  ;;  %2059 = vmatpush1.bf16.msra.mxu1 %v2719_v29 }
 0x144   :  { %2029 = vmatprep.subr.bf16.mxu0 %v2726_v33  ;;  %2061 = vmatprep.subr.bf16.mxu1 %v2734_v39 }
 0x145   :  { %855 = vmatprep.mubr.f32.mxu0 %v2659_v3  ;;  %926 = vmatprep.mubr.f32.mxu1 %v2659_v3 }
 0x147   :  { %2031 = vmatpush1.bf16.msra.mxu0 %v2730_v36  ;;  %2063 = vmatpush1.bf16.msra.mxu1 %v2738_v42 }
 0x148   :  { %2033 = vmatprep.subr.bf16.mxu0 %v2745_v46  ;;  %2065 = vmatprep.subr.bf16.mxu1 %v2753_v52 }
 0x14b   :  { %2035 = vmatpush1.bf16.msra.mxu0 %v2749_v49  ;;  %2067 = vmatpush1.bf16.msra.mxu1 %v2757_v55 }
 0x14c   :  { %2037 = vmatprep.subr.bf16.mxu0 %v2764_v59  ;;  %2069 = vmatprep.subr.bf16.mxu1 %v2772_v1 }
 0x14f   :  { %2039 = vmatpush1.bf16.msra.mxu0 %v2768_v62  ;;  %2071 = vmatpush1.bf16.msra.mxu1 %v2776_v6 }
 0x150   :  { %2041 = vmatprep.subr.bf16.mxu0 %v2783_v10  ;;  %2073 = vmatprep.subr.bf16.mxu1 %v2791_v16 }
 0x153   :  { %2043 = vmatpush1.bf16.msra.mxu0 %v2787_v13  ;;  %2075 = vmatpush1.bf16.msra.mxu1 %v2795_v20 }
 0x154   :  { %2045 = vmatprep.subr.bf16.mxu0 %v2802_v25  ;;  %2077 = vmatprep.subr.bf16.mxu1 %v2810_v34 }
 0x157   :  { %2047 = vmatpush1.bf16.msra.mxu0 %v2806_v30  ;;  %2079 = vmatpush1.bf16.msra.mxu1 %v2814_v38 }
 0x158   :  { %2049 = vmatprep.subr.bf16.mxu0 %v2821_v44  ;;  %2081 = vmatprep.subr.bf16.mxu1 %v2829_v53 }
 0x15b   :  { %2051 = vmatpush1.bf16.msra.mxu0 %v2825_v48  ;;  %2083 = vmatpush1.bf16.msra.mxu1 %v2833_v57 }
 0x15c   :  { %2053 = vmatprep.subr.bf16.mxu0 %v2840_v63  ;;  %2085 = vmatprep.subr.bf16.mxu1 %v2848_v7 }
 0x15f   :  { %2055 = vmatpush1.bf16.msra.mxu0 %v2844_v5  ;;  %2087 = vmatpush1.bf16.msra.mxu1 %v2852_v8 }
 0x160   :  { %2089 = vmatprep.subr.bf16.mxu0 %v2709_v19  ;;  %2121 = vmatprep.subr.bf16.mxu1 %v2715_v26 }
 0x215   :  { %v682_v18 = vpop.f32.mrb[2].mxu0  ;;  %v753_v21 = vpop.f32.mrb[2].mxu1 }
 0x216   :  { %v2410_v22 = vadd.f32 %v682_v18, %v2905_v14  ;;  %v684_v24 = vpop.f32.mrb[3].mxu0  ;;  %v755_v27 = vpop.f32.mrb[3].mxu1  ;;  %v2426_v43 = vadd.f32 %v753_v21, %v2916_v41 }
 0x217   :  { %v2411_v28 = vadd.f32 %v684_v24, %v2907_v15  ;;  %v2427_v37 = vadd.f32 %v755_v27, %v2912_v35 }
 0x218   :  { %v1875_v31 = vmul.f32 -1.442695, %v2410_v22 }
 0x219   :  { %v1876_v32 = vmul.f32 -1.442695, %v2411_v28  ;;  %v1877_v40 = vmul.f32 -1.442695, %v2427_v37 }
 0x21a   :  { %2495 = vpow2.f32 %v1875_v31 }
 0x21b   :  { %2497 = vpow2.f32 %v1876_v32 }
 0x21c   :  { %2499 = vpow2.f32 %v1877_v40 }
 0x21d   :  { %2501 = vtanh.f32 %v2426_v43 }
 0x224   :  { %v2496_v45 = vpop.eup %2495 }
 0x225   :  { %v2498_v47 = vpop.eup %2497  ;;  %v765_v50 = vadd.f32 1.0, %v2496_v45 }
 0x226   :  { %v771_v51 = vadd.f32 1.0, %v2498_v47  ;;  %v2500_v54 = vpop.eup %2499 }
 0x227   :  { %2503 = vrcp.f32 %v765_v50  ;;  %v2502_v56 = vpop.eup %2501  ;;  %v778_v61 = vadd.f32 1.0, %v2500_v54 }
 0x228   :  { %2505 = vrcp.f32 %v771_v51 }
 0x229   :  { %2507 = vrcp.f32 %v778_v61 }
 0x231   :  { %v2504_v58 = vpop.eup %2503 }
 0x232   :  { %v2506_v4 = vpop.eup %2505  ;;  %v782_v60 = vmul.f32 %v2504_v58, %v2502_v56 }
 0x233   :  { %v781_v0 = vmul.f32 %v2506_v4, %v2919_v9  ;;  %v2508_v11 = vpop.eup %2507 }
 0x235   :  { %v2961_v2 = vadd.f32 %v782_v60, %v781_v0 }
 0x237   :  { %2509 = vtanh.f32 %v2961_v2 }
 0x241   :  { %v2510_v12 = vpop.eup %2509 }
 0x242   :  { %v785_v17 = vmul.f32 %v2510_v12, %v2508_v11 }
 0x244   :  { %856 = vmatmul.mubr.f32.vlgmr.msra.gmra.mrb[4].mxu0 %v785_v17  ;;  %927 = vmatmul.mubr.f32.vlgmr.msra.gmra.mrb[4].mxu1 %v785_v17 }
 0x245   :  { %2091 = vmatpush1.bf16.msra.mxu0 %v2712_v23  ;;  %2123 = vmatpush1.bf16.msra.mxu1 %v2719_v29 }
 0x246   :  { %2093 = vmatprep.subr.bf16.mxu0 %v2726_v33  ;;  %2125 = vmatprep.subr.bf16.mxu1 %v2734_v39 }
 0x247   :  { %1030 = vmatprep.mubr.f32.mxu0 %v2659_v3  ;;  %1101 = vmatprep.mubr.f32.mxu1 %v2659_v3 }
 0x249   :  { %2095 = vmatpush1.bf16.msra.mxu0 %v2730_v36  ;;  %2127 = vmatpush1.bf16.msra.mxu1 %v2738_v42 }
 0x24a   :  { %2097 = vmatprep.subr.bf16.mxu0 %v2745_v46  ;;  %2129 = vmatprep.subr.bf16.mxu1 %v2753_v52 }
 0x24d   :  { %2099 = vmatpush1.bf16.msra.mxu0 %v2749_v49  ;;  %2131 = vmatpush1.bf16.msra.mxu1 %v2757_v55 }
 0x24e   :  { %2101 = vmatprep.subr.bf16.mxu0 %v2764_v59  ;;  %2133 = vmatprep.subr.bf16.mxu1 %v2772_v1 }
 0x251   :  { %2103 = vmatpush1.bf16.msra.mxu0 %v2768_v62  ;;  %2135 = vmatpush1.bf16.msra.mxu1 %v2776_v6 }
 0x252   :  { %2105 = vmatprep.subr.bf16.mxu0 %v2783_v10  ;;  %2137 = vmatprep.subr.bf16.mxu1 %v2791_v16 }
 0x255   :  { %2107 = vmatpush1.bf16.msra.mxu0 %v2787_v13  ;;  %2139 = vmatpush1.bf16.msra.mxu1 %v2795_v20 }
 0x256   :  { %2109 = vmatprep.subr.bf16.mxu0 %v2802_v25  ;;  %2141 = vmatprep.subr.bf16.mxu1 %v2810_v34 }
 0x259   :  { %2111 = vmatpush1.bf16.msra.mxu0 %v2806_v30  ;;  %2143 = vmatpush1.bf16.msra.mxu1 %v2814_v38 }
 0x25a   :  { %2113 = vmatprep.subr.bf16.mxu0 %v2821_v44  ;;  %2145 = vmatprep.subr.bf16.mxu1 %v2829_v53 }
 0x25d   :  { %2115 = vmatpush1.bf16.msra.mxu0 %v2825_v48  ;;  %2147 = vmatpush1.bf16.msra.mxu1 %v2833_v57 }
 0x25e   :  { %2117 = vmatprep.subr.bf16.mxu0 %v2840_v63  ;;  %2149 = vmatprep.subr.bf16.mxu1 %v2848_v7 }
 0x261   :  { %2119 = vmatpush1.bf16.msra.mxu0 %v2844_v5  ;;  %2151 = vmatpush1.bf16.msra.mxu1 %v2852_v8 }
 0x262   :  { %2153 = vmatprep.subr.bf16.mxu0 %v2709_v19  ;;  %2185 = vmatprep.subr.bf16.mxu1 %v2715_v26 }
 0x317   :  { %v857_v9 = vpop.f32.mrb[4].mxu0  ;;  %v928_v18 = vpop.f32.mrb[4].mxu1 }
 0x318   :  { %v2412_v21 = vadd.f32 %v857_v9, %v2905_v14  ;;  %v859_v22 = vpop.f32.mrb[5].mxu0  ;;  %v930_v24 = vpop.f32.mrb[5].mxu1  ;;  %v2428_v40 = vadd.f32 %v928_v18, %v2916_v41 }
 0x319   :  { %v2413_v27 = vadd.f32 %v859_v22, %v2907_v15  ;;  %v2429_v32 = vadd.f32 %v930_v24, %v2912_v35 }
 0x31a   :  { %v1878_v28 = vmul.f32 -1.442695, %v2412_v21 }
 0x31b   :  { %v1879_v31 = vmul.f32 -1.442695, %v2413_v27  ;;  %v1880_v37 = vmul.f32 -1.442695, %v2429_v32 }
 0x31c   :  { %2511 = vpow2.f32 %v1878_v28 }
 0x31d   :  { %2513 = vpow2.f32 %v1879_v31 }
 0x31e   :  { %2515 = vpow2.f32 %v1880_v37 }
 0x31f   :  { %2517 = vtanh.f32 %v2428_v40 }
 0x326   :  { %v2512_v43 = vpop.eup %2511 }
 0x327   :  { %v2514_v45 = vpop.eup %2513  ;;  %v940_v47 = vadd.f32 1.0, %v2512_v43 }
 0x328   :  { %v946_v50 = vadd.f32 1.0, %v2514_v45  ;;  %v2516_v51 = vpop.eup %2515 }
 0x329   :  { %2519 = vrcp.f32 %v940_v47  ;;  %v2518_v54 = vpop.eup %2517  ;;  %v953_v60 = vadd.f32 1.0, %v2516_v51 }
 0x32a   :  { %2521 = vrcp.f32 %v946_v50 }
 0x32b   :  { %2523 = vrcp.f32 %v953_v60 }
 0x333   :  { %v2520_v56 = vpop.eup %2519 }
 0x334   :  { %v2522_v58 = vpop.eup %2521  ;;  %v957_v4 = vmul.f32 %v2520_v56, %v2518_v54 }
 0x335   :  { %v956_v61 = vmul.f32 %v2522_v58, %v2961_v2  ;;  %v2524_v11 = vpop.eup %2523 }
 0x337   :  { %v3003_v0 = vadd.f32 %v957_v4, %v956_v61 }
 0x339   :  { %2525 = vtanh.f32 %v3003_v0 }
 0x343   :  { %v2526_v12 = vpop.eup %2525 }
 0x344   :  { %v960_v17 = vmul.f32 %v2526_v12, %v2524_v11 }
 0x346   :  { %1031 = vmatmul.mubr.f32.vlgmr.msra.gmra.mrb[6].mxu0 %v960_v17  ;;  %1102 = vmatmul.mubr.f32.vlgmr.msra.gmra.mrb[6].mxu1 %v960_v17 }
 0x347   :  { %2155 = vmatpush1.bf16.msra.mxu0 %v2712_v23  ;;  %2187 = vmatpush1.bf16.msra.mxu1 %v2719_v29 }
 0x348   :  { %2157 = vmatprep.subr.bf16.mxu0 %v2726_v33  ;;  %2189 = vmatprep.subr.bf16.mxu1 %v2734_v39 }
 0x349   :  { %1205 = vmatprep.mubr.f32.mxu0 %v2659_v3  ;;  %1276 = vmatprep.mubr.f32.mxu1 %v2659_v3 }
 0x34b   :  { %2159 = vmatpush1.bf16.msra.mxu0 %v2730_v36  ;;  %2191 = vmatpush1.bf16.msra.mxu1 %v2738_v42 }
 0x34c   :  { %2161 = vmatprep.subr.bf16.mxu0 %v2745_v46  ;;  %2193 = vmatprep.subr.bf16.mxu1 %v2753_v52 }
 0x34f   :  { %2163 = vmatpush1.bf16.msra.mxu0 %v2749_v49  ;;  %2195 = vmatpush1.bf16.msra.mxu1 %v2757_v55 }
 0x350   :  { %2165 = vmatprep.subr.bf16.mxu0 %v2764_v59  ;;  %2197 = vmatprep.subr.bf16.mxu1 %v2772_v1 }
 0x353   :  { %2167 = vmatpush1.bf16.msra.mxu0 %v2768_v62  ;;  %2199 = vmatpush1.bf16.msra.mxu1 %v2776_v6 }
 0x354   :  { %2169 = vmatprep.subr.bf16.mxu0 %v2783_v10  ;;  %2201 = vmatprep.subr.bf16.mxu1 %v2791_v16 }
 0x357   :  { %2171 = vmatpush1.bf16.msra.mxu0 %v2787_v13  ;;  %2203 = vmatpush1.bf16.msra.mxu1 %v2795_v20 }
 0x358   :  { %2173 = vmatprep.subr.bf16.mxu0 %v2802_v25  ;;  %2205 = vmatprep.subr.bf16.mxu1 %v2810_v34 }
 0x35b   :  { %2175 = vmatpush1.bf16.msra.mxu0 %v2806_v30  ;;  %2207 = vmatpush1.bf16.msra.mxu1 %v2814_v38 }
 0x35c   :  { %2177 = vmatprep.subr.bf16.mxu0 %v2821_v44  ;;  %2209 = vmatprep.subr.bf16.mxu1 %v2829_v53 }
 0x35f   :  { %2179 = vmatpush1.bf16.msra.mxu0 %v2825_v48  ;;  %2211 = vmatpush1.bf16.msra.mxu1 %v2833_v57 }
 0x360   :  { %2181 = vmatprep.subr.bf16.mxu0 %v2840_v63  ;;  %2213 = vmatprep.subr.bf16.mxu1 %v2848_v7 }
 0x363   :  { %2183 = vmatpush1.bf16.msra.mxu0 %v2844_v5  ;;  %2215 = vmatpush1.bf16.msra.mxu1 %v2852_v8 }
 0x364   :  { %2217 = vmatprep.subr.bf16.mxu0 %v2709_v19  ;;  %2249 = vmatprep.subr.bf16.mxu1 %v2715_v26 }
 0x419   :  { %v1032_v2 = vpop.f32.mrb[6].mxu0  ;;  %v1103_v9 = vpop.f32.mrb[6].mxu1 }
 0x41a   :  { %v2414_v18 = vadd.f32 %v1032_v2, %v2905_v14  ;;  %v1034_v21 = vpop.f32.mrb[7].mxu0  ;;  %v1105_v22 = vpop.f32.mrb[7].mxu1  ;;  %v2430_v37 = vadd.f32 %v1103_v9, %v2916_v41 }
 0x41b   :  { %v2415_v24 = vadd.f32 %v1034_v21, %v2907_v15  ;;  %v2431_v31 = vadd.f32 %v1105_v22, %v2912_v35 }
 0x41c   :  { %v1881_v27 = vmul.f32 -1.442695, %v2414_v18 }
 0x41d   :  { %v1882_v28 = vmul.f32 -1.442695, %v2415_v24  ;;  %v1883_v32 = vmul.f32 -1.442695, %v2431_v31 }
 0x41e   :  { %2527 = vpow2.f32 %v1881_v27 }
 0x41f   :  { %2529 = vpow2.f32 %v1882_v28 }
 0x420   :  { %2531 = vpow2.f32 %v1883_v32 }
 0x421   :  { %2533 = vtanh.f32 %v2430_v37 }
 0x428   :  { %v2528_v40 = vpop.eup %2527 }
 0x429   :  { %v2530_v43 = vpop.eup %2529  ;;  %v1115_v45 = vadd.f32 1.0, %v2528_v40 }
 0x42a   :  { %v1121_v47 = vadd.f32 1.0, %v2530_v43  ;;  %v2532_v50 = vpop.eup %2531 }
 0x42b   :  { %2535 = vrcp.f32 %v1115_v45  ;;  %v2534_v51 = vpop.eup %2533  ;;  %v1128_v4 = vadd.f32 1.0, %v2532_v50 }
 0x42c   :  { %2537 = vrcp.f32 %v1121_v47 }
 0x42d   :  { %2539 = vrcp.f32 %v1128_v4 }
 0x435   :  { %v2536_v54 = vpop.eup %2535 }
 0x436   :  { %v2538_v56 = vpop.eup %2537  ;;  %v1132_v58 = vmul.f32 %v2536_v54, %v2534_v51 }
 0x437   :  { %v1131_v60 = vmul.f32 %v2538_v56, %v3003_v0  ;;  %v2540_v11 = vpop.eup %2539 }
 0x439   :  { %v3045_v61 = vadd.f32 %v1132_v58, %v1131_v60 }
 0x43b   :  { %2541 = vtanh.f32 %v3045_v61 }
 0x445   :  { %v2542_v12 = vpop.eup %2541 }
 0x446   :  { %v1135_v17 = vmul.f32 %v2542_v12, %v2540_v11 }
 0x448   :  { %1206 = vmatmul.mubr.f32.vlgmr.msra.gmra.mrb[8].mxu0 %v1135_v17  ;;  %1277 = vmatmul.mubr.f32.vlgmr.msra.gmra.mrb[8].mxu1 %v1135_v17 }
 0x449   :  { %2219 = vmatpush1.bf16.msra.mxu0 %v2712_v23  ;;  %2251 = vmatpush1.bf16.msra.mxu1 %v2719_v29 }
 0x44a   :  { %2221 = vmatprep.subr.bf16.mxu0 %v2726_v33  ;;  %2253 = vmatprep.subr.bf16.mxu1 %v2734_v39 }
 0x44b   :  { %1380 = vmatprep.mubr.f32.mxu0 %v2659_v3  ;;  %1451 = vmatprep.mubr.f32.mxu1 %v2659_v3 }
 0x44d   :  { %2223 = vmatpush1.bf16.msra.mxu0 %v2730_v36  ;;  %2255 = vmatpush1.bf16.msra.mxu1 %v2738_v42 }
 0x44e   :  { %2225 = vmatprep.subr.bf16.mxu0 %v2745_v46  ;;  %2257 = vmatprep.subr.bf16.mxu1 %v2753_v52 }
 0x451   :  { %2227 = vmatpush1.bf16.msra.mxu0 %v2749_v49  ;;  %2259 = vmatpush1.bf16.msra.mxu1 %v2757_v55 }
 0x452   :  { %2229 = vmatprep.subr.bf16.mxu0 %v2764_v59  ;;  %2261 = vmatprep.subr.bf16.mxu1 %v2772_v1 }
 0x455   :  { %2231 = vmatpush1.bf16.msra.mxu0 %v2768_v62  ;;  %2263 = vmatpush1.bf16.msra.mxu1 %v2776_v6 }
 0x456   :  { %2233 = vmatprep.subr.bf16.mxu0 %v2783_v10  ;;  %2265 = vmatprep.subr.bf16.mxu1 %v2791_v16 }
 0x459   :  { %2235 = vmatpush1.bf16.msra.mxu0 %v2787_v13  ;;  %2267 = vmatpush1.bf16.msra.mxu1 %v2795_v20 }
 0x45a   :  { %2237 = vmatprep.subr.bf16.mxu0 %v2802_v25  ;;  %2269 = vmatprep.subr.bf16.mxu1 %v2810_v34 }
 0x45d   :  { %2239 = vmatpush1.bf16.msra.mxu0 %v2806_v30  ;;  %2271 = vmatpush1.bf16.msra.mxu1 %v2814_v38 }
 0x45e   :  { %2241 = vmatprep.subr.bf16.mxu0 %v2821_v44  ;;  %2273 = vmatprep.subr.bf16.mxu1 %v2829_v53 }
 0x461   :  { %2243 = vmatpush1.bf16.msra.mxu0 %v2825_v48  ;;  %2275 = vmatpush1.bf16.msra.mxu1 %v2833_v57 }
 0x462   :  { %2245 = vmatprep.subr.bf16.mxu0 %v2840_v63  ;;  %2277 = vmatprep.subr.bf16.mxu1 %v2848_v7 }
 0x465   :  { %2247 = vmatpush1.bf16.msra.mxu0 %v2844_v5  ;;  %2279 = vmatpush1.bf16.msra.mxu1 %v2852_v8 }
 0x466   :  { %2281 = vmatprep.subr.bf16.mxu0 %v2709_v19  ;;  %2313 = vmatprep.subr.bf16.mxu1 %v2715_v26 }
 0x51b   :  { %v1207_v0 = vpop.f32.mrb[8].mxu0  ;;  %v1278_v2 = vpop.f32.mrb[8].mxu1 }
 0x51c   :  { %v2416_v9 = vadd.f32 %v1207_v0, %v2905_v14  ;;  %v1209_v18 = vpop.f32.mrb[9].mxu0  ;;  %v1280_v21 = vpop.f32.mrb[9].mxu1  ;;  %v2432_v32 = vadd.f32 %v1278_v2, %v2916_v41 }
 0x51d   :  { %v2417_v22 = vadd.f32 %v1209_v18, %v2907_v15  ;;  %v2433_v28 = vadd.f32 %v1280_v21, %v2912_v35 }
 0x51e   :  { %v1884_v24 = vmul.f32 -1.442695, %v2416_v9 }
 0x51f   :  { %v1885_v27 = vmul.f32 -1.442695, %v2417_v22  ;;  %v1886_v31 = vmul.f32 -1.442695, %v2433_v28 }
 0x520   :  { %2543 = vpow2.f32 %v1884_v24 }
 0x521   :  { %2545 = vpow2.f32 %v1885_v27 }
 0x522   :  { %2547 = vpow2.f32 %v1886_v31 }
 0x523   :  { %2549 = vtanh.f32 %v2432_v32 }
 0x52a   :  { %v2544_v37 = vpop.eup %2543 }
 0x52b   :  { %v2546_v40 = vpop.eup %2545  ;;  %v1290_v43 = vadd.f32 1.0, %v2544_v37 }
 0x52c   :  { %v1296_v45 = vadd.f32 1.0, %v2546_v40  ;;  %v2548_v47 = vpop.eup %2547 }
 0x52d   :  { %2551 = vrcp.f32 %v1290_v43  ;;  %v2550_v50 = vpop.eup %2549  ;;  %v1303_v58 = vadd.f32 1.0, %v2548_v47 }
 0x52e   :  { %2553 = vrcp.f32 %v1296_v45 }
 0x52f   :  { %2555 = vrcp.f32 %v1303_v58 }
 0x537   :  { %v2552_v51 = vpop.eup %2551 }
 0x538   :  { %v2554_v54 = vpop.eup %2553  ;;  %v1307_v56 = vmul.f32 %v2552_v51, %v2550_v50 }
 0x539   :  { %v1306_v4 = vmul.f32 %v2554_v54, %v3045_v61  ;;  %v2556_v11 = vpop.eup %2555 }
 0x53b   :  { %v3087_v60 = vadd.f32 %v1307_v56, %v1306_v4 }
 0x53d   :  { %2557 = vtanh.f32 %v3087_v60 }
 0x547   :  { %v2558_v12 = vpop.eup %2557 }
 0x548   :  { %v1310_v17 = vmul.f32 %v2558_v12, %v2556_v11 }
 0x54a   :  { %1381 = vmatmul.mubr.f32.vlgmr.msra.gmra.mrb[10].mxu0 %v1310_v17  ;;  %1452 = vmatmul.mubr.f32.vlgmr.msra.gmra.mrb[10].mxu1 %v1310_v17 }
 0x54b   :  { %2283 = vmatpush1.bf16.msra.mxu0 %v2712_v23  ;;  %2315 = vmatpush1.bf16.msra.mxu1 %v2719_v29 }
 0x54c   :  { %2285 = vmatprep.subr.bf16.mxu0 %v2726_v33  ;;  %2317 = vmatprep.subr.bf16.mxu1 %v2734_v39 }
 0x54d   :  { %1555 = vmatprep.mubr.f32.mxu0 %v2659_v3  ;;  %1626 = vmatprep.mubr.f32.mxu1 %v2659_v3 }
 0x54f   :  { %2287 = vmatpush1.bf16.msra.mxu0 %v2730_v36  ;;  %2319 = vmatpush1.bf16.msra.mxu1 %v2738_v42 }
 0x550   :  { %2289 = vmatprep.subr.bf16.mxu0 %v2745_v46  ;;  %2321 = vmatprep.subr.bf16.mxu1 %v2753_v52 }
 0x553   :  { %2291 = vmatpush1.bf16.msra.mxu0 %v2749_v49  ;;  %2323 = vmatpush1.bf16.msra.mxu1 %v2757_v55 }
 0x554   :  { %2293 = vmatprep.subr.bf16.mxu0 %v2764_v59  ;;  %2325 = vmatprep.subr.bf16.mxu1 %v2772_v1 }
 0x557   :  { %2295 = vmatpush1.bf16.msra.mxu0 %v2768_v62  ;;  %2327 = vmatpush1.bf16.msra.mxu1 %v2776_v6 }
 0x558   :  { %2297 = vmatprep.subr.bf16.mxu0 %v2783_v10  ;;  %2329 = vmatprep.subr.bf16.mxu1 %v2791_v16 }
 0x55b   :  { %2299 = vmatpush1.bf16.msra.mxu0 %v2787_v13  ;;  %2331 = vmatpush1.bf16.msra.mxu1 %v2795_v20 }
 0x55c   :  { %2301 = vmatprep.subr.bf16.mxu0 %v2802_v25  ;;  %2333 = vmatprep.subr.bf16.mxu1 %v2810_v34 }
 0x55f   :  { %2303 = vmatpush1.bf16.msra.mxu0 %v2806_v30  ;;  %2335 = vmatpush1.bf16.msra.mxu1 %v2814_v38 }
 0x560   :  { %2305 = vmatprep.subr.bf16.mxu0 %v2821_v44  ;;  %2337 = vmatprep.subr.bf16.mxu1 %v2829_v53 }
 0x563   :  { %2307 = vmatpush1.bf16.msra.mxu0 %v2825_v48  ;;  %2339 = vmatpush1.bf16.msra.mxu1 %v2833_v57 }
 0x564   :  { %2309 = vmatprep.subr.bf16.mxu0 %v2840_v63  ;;  %2341 = vmatprep.subr.bf16.mxu1 %v2848_v7 }
 0x567   :  { %2311 = vmatpush1.bf16.msra.mxu0 %v2844_v5  ;;  %2343 = vmatpush1.bf16.msra.mxu1 %v2852_v8 }
 0x568   :  { %2345 = vmatprep.subr.bf16.mxu0 %v2709_v19  ;;  %2377 = vmatprep.subr.bf16.mxu1 %v2715_v26 }
 0x61d   :  { %v1382_v61 = vpop.f32.mrb[10].mxu0  ;;  %v1453_v0 = vpop.f32.mrb[10].mxu1 }
 0x61e   :  { %v2418_v2 = vadd.f32 %v1382_v61, %v2905_v14  ;;  %v1384_v9 = vpop.f32.mrb[11].mxu0  ;;  %v1455_v18 = vpop.f32.mrb[11].mxu1  ;;  %v2434_v31 = vadd.f32 %v1453_v0, %v2916_v41 }
 0x61f   :  { %v2419_v21 = vadd.f32 %v1384_v9, %v2907_v15  ;;  %v2435_v27 = vadd.f32 %v1455_v18, %v2912_v35 }
 0x620   :  { %v1887_v22 = vmul.f32 -1.442695, %v2418_v2 }
 0x621   :  { %v1888_v24 = vmul.f32 -1.442695, %v2419_v21  ;;  %v1889_v28 = vmul.f32 -1.442695, %v2435_v27 }
 0x622   :  { %2559 = vpow2.f32 %v1887_v22 }
 0x623   :  { %2561 = vpow2.f32 %v1888_v24 }
 0x624   :  { %2563 = vpow2.f32 %v1889_v28 }
 0x625   :  { %2565 = vtanh.f32 %v2434_v31 }
 0x62c   :  { %v2560_v19 = vpop.eup %2559 }
 0x62d   :  { %v2562_v32 = vpop.eup %2561  ;;  %v1465_v26 = vadd.f32 1.0, %v2560_v19 }
 0x62e   :  { %v1471_v37 = vadd.f32 1.0, %v2562_v32  ;;  %v2564_v40 = vpop.eup %2563 }
 0x62f   :  { %2567 = vrcp.f32 %v1465_v26  ;;  %v2566_v43 = vpop.eup %2565  ;;  %v1478_v51 = vadd.f32 1.0, %v2564_v40 }
 0x630   :  { %2569 = vrcp.f32 %v1471_v37 }
 0x631   :  { %2571 = vrcp.f32 %v1478_v51 }
 0x639   :  { %v2568_v45 = vpop.eup %2567 }
 0x63a   :  { %v2570_v47 = vpop.eup %2569  ;;  %v1482_v50 = vmul.f32 %v2568_v45, %v2566_v43 }
 0x63b   :  { %v1481_v54 = vmul.f32 %v2570_v47, %v3087_v60  ;;  %v2572_v58 = vpop.eup %2571 }
 0x63d   :  { %v3129_v56 = vadd.f32 %v1482_v50, %v1481_v54 }
 0x63f   :  { %2573 = vtanh.f32 %v3129_v56 }
 0x649   :  { %v2574_v4 = vpop.eup %2573 }
 0x64a   :  { %v1485_v11 = vmul.f32 %v2574_v4, %v2572_v58 }
 0x64c   :  { %1556 = vmatmul.mubr.f32.vlgmr.msra.gmra.mrb[12].mxu0 %v1485_v11  ;;  %1627 = vmatmul.mubr.f32.vlgmr.msra.gmra.mrb[12].mxu1 %v1485_v11 }
 0x64d   :  { %2347 = vmatpush1.bf16.msra.mxu0 %v2712_v23  ;;  %2379 = vmatpush1.bf16.msra.mxu1 %v2719_v29 }
 0x64e   :  { %2349 = vmatprep.subr.bf16.mxu0 %v2726_v33  ;;  %2381 = vmatprep.subr.bf16.mxu1 %v2734_v39 }
 0x64f   :  { %1730 = vmatprep.mubr.f32.mxu0 %v2659_v3  ;;  %1801 = vmatprep.mubr.f32.mxu1 %v2659_v3 }
 0x651   :  { %2351 = vmatpush1.bf16.msra.mxu0 %v2730_v36  ;;  %2383 = vmatpush1.bf16.msra.mxu1 %v2738_v42 }
 0x652   :  { %2353 = vmatprep.subr.bf16.mxu0 %v2745_v46  ;;  %2385 = vmatprep.subr.bf16.mxu1 %v2753_v52 }
 0x655   :  { %2355 = vmatpush1.bf16.msra.mxu0 %v2749_v49  ;;  %2387 = vmatpush1.bf16.msra.mxu1 %v2757_v55 }
 0x656   :  { %2357 = vmatprep.subr.bf16.mxu0 %v2764_v59  ;;  %2389 = vmatprep.subr.bf16.mxu1 %v2772_v1 }
 0x659   :  { %2359 = vmatpush1.bf16.msra.mxu0 %v2768_v62  ;;  %2391 = vmatpush1.bf16.msra.mxu1 %v2776_v6 }
 0x65a   :  { %2361 = vmatprep.subr.bf16.mxu0 %v2783_v10  ;;  %2393 = vmatprep.subr.bf16.mxu1 %v2791_v16 }
 0x65d   :  { %2363 = vmatpush1.bf16.msra.mxu0 %v2787_v13  ;;  %2395 = vmatpush1.bf16.msra.mxu1 %v2795_v20 }
 0x65e   :  { %2365 = vmatprep.subr.bf16.mxu0 %v2802_v25  ;;  %2397 = vmatprep.subr.bf16.mxu1 %v2810_v34 }
 0x661   :  { %2367 = vmatpush1.bf16.msra.mxu0 %v2806_v30  ;;  %2399 = vmatpush1.bf16.msra.mxu1 %v2814_v38 }
 0x662   :  { %2369 = vmatprep.subr.bf16.mxu0 %v2821_v44  ;;  %2401 = vmatprep.subr.bf16.mxu1 %v2829_v53 }
 0x665   :  { %2371 = vmatpush1.bf16.msra.mxu0 %v2825_v48  ;;  %2403 = vmatpush1.bf16.msra.mxu1 %v2833_v57 }
 0x666   :  { %2373 = vmatprep.subr.bf16.mxu0 %v2840_v63  ;;  %2405 = vmatprep.subr.bf16.mxu1 %v2848_v7 }
 0x669   :  { %2375 = vmatpush1.bf16.msra.mxu0 %v2844_v5  ;;  %2407 = vmatpush1.bf16.msra.mxu1 %v2852_v8 }
 0x71f   :  { %v1557_v3 = vpop.f32.mrb[12].mxu0  ;;  %v1628_v23 = vpop.f32.mrb[12].mxu1 }
 0x720   :  { %v2420_v29 = vadd.f32 %v1557_v3, %v2905_v14  ;;  %v1559_v33 = vpop.f32.mrb[13].mxu0  ;;  %v1630_v36 = vpop.f32.mrb[13].mxu1  ;;  %v2436_v55 = vadd.f32 %v1628_v23, %v2916_v41 }
 0x721   :  { %v2421_v39 = vadd.f32 %v1559_v33, %v2907_v15  ;;  %v2437_v49 = vadd.f32 %v1630_v36, %v2912_v35 }
 0x722   :  { %v1890_v42 = vmul.f32 -1.442695, %v2420_v29 }
 0x723   :  { %v1891_v46 = vmul.f32 -1.442695, %v2421_v39  ;;  %v1892_v52 = vmul.f32 -1.442695, %v2437_v49 }
 0x724   :  { %2575 = vpow2.f32 %v1890_v42 }
 0x725   :  { %2577 = vpow2.f32 %v1891_v46 }
 0x726   :  { %2579 = vpow2.f32 %v1892_v52 }
 0x727   :  { %2581 = vtanh.f32 %v2436_v55 }
 0x72e   :  { %v2576_v59 = vpop.eup %2575 }
 0x72f   :  { %v2578_v62 = vpop.eup %2577  ;;  %v1640_v1 = vadd.f32 1.0, %v2576_v59 }
 0x730   :  { %v1646_v6 = vadd.f32 1.0, %v2578_v62  ;;  %v2580_v10 = vpop.eup %2579 }
 0x731   :  { %2583 = vrcp.f32 %v1640_v1  ;;  %v2582_v13 = vpop.eup %2581  ;;  %v1653_v30 = vadd.f32 1.0, %v2580_v10 }
 0x732   :  { %2585 = vrcp.f32 %v1646_v6 }
 0x733   :  { %2587 = vrcp.f32 %v1653_v30 }
 0x73b   :  { %v2584_v16 = vpop.eup %2583 }
 0x73c   :  { %v2586_v20 = vpop.eup %2585  ;;  %v1657_v25 = vmul.f32 %v2584_v16, %v2582_v13 }
 0x73d   :  { %v1656_v34 = vmul.f32 %v2586_v20, %v3129_v56  ;;  %v2588_v44 = vpop.eup %2587 }
 0x73f   :  { %v1658_v38 = vadd.f32 %v1657_v25, %v1656_v34 }
 0x741   :  { %2589 = vtanh.f32 %v1658_v38 }
 0x74b   :  { %v2590_v48 = vpop.eup %2589 }
 0x74c   :  { %v1660_v53 = vmul.f32 %v2590_v48, %v2588_v44 }
 0x74e   :  { %1731 = vmatmul.mubr.f32.vlgmr.msra.gmra.mrb[14].mxu0 %v1660_v53  ;;  %1802 = vmatmul.mubr.f32.vlgmr.msra.gmra.mrb[14].mxu1 %v1660_v53 }
 0x821   :  { %v1732_v57 = vpop.f32.mrb[14].mxu0  ;;  %v1803_v63 = vpop.f32.mrb[14].mxu1 }
 0x822   :  { %v2422_v5 = vadd.f32 %v1732_v57, %v2905_v14  ;;  %v1734_v7 = vpop.f32.mrb[15].mxu0  ;;  %v1805_v8 = vpop.f32.mrb[15].mxu1  ;;  %v2438_v2 = vadd.f32 %v1803_v63, %v2916_v41 }
 0x823   :  { %v2423_v60 = vadd.f32 %v1734_v7, %v2907_v15  ;;  %v2439_v61 = vadd.f32 %v1805_v8, %v2912_v35 }
 0x824   :  { %v1893_v12 = vmul.f32 -1.442695, %v2422_v5 }
 0x825   :  { %v1894_v17 = vmul.f32 -1.442695, %v2423_v60  ;;  %v1895_v0 = vmul.f32 -1.442695, %v2439_v61 }
 0x826   :  { %2591 = vpow2.f32 %v1893_v12 }
 0x827   :  { %2593 = vpow2.f32 %v1894_v17 }
 0x828   :  { %2595 = vpow2.f32 %v1895_v0 }
 0x829   :  { %2597 = vtanh.f32 %v2438_v2 }
 0x830   :  { %v2592_v9 = vpop.eup %2591 }
 0x831   :  { %v2594_v18 = vpop.eup %2593  ;;  %v1815_v21 = vadd.f32 1.0, %v2592_v9 }
 0x832   :  { %v1821_v22 = vadd.f32 1.0, %v2594_v18  ;;  %v2596_v14 = vpop.eup %2595 }
 0x833   :  { %2599 = vrcp.f32 %v1815_v21  ;;  %v2598_v24 = vpop.eup %2597  ;;  %v1828_v31 = vadd.f32 1.0, %v2596_v14 }
 0x834   :  { %2601 = vrcp.f32 %v1821_v22 }
 0x835   :  { %2603 = vrcp.f32 %v1828_v31 }
 0x83d   :  { %v2600_v15 = vpop.eup %2599 }
 0x83e   :  { %v2602_v27 = vpop.eup %2601  ;;  %v1832_v28 = vmul.f32 %v2600_v15, %v2598_v24 }
 0x83f   :  { %v1831_v19 = vmul.f32 %v2602_v27, %v1658_v38  ;;  %v2604_v35 = vpop.eup %2603 }
 0x841   :  { %v1833_v32 = vadd.f32 %v1832_v28, %v1831_v19 }
 0x843   :  { %2605 = vtanh.f32 %v1833_v32 }
 0x84d   :  { %v2606_v41 = vpop.eup %2605 }
 0x84e   :  { %v1835_v26 = vmul.f32 %v2606_v41, %v2604_v35 }
 0x850   :  { %1836 = vst [vmem:[#allocation6] sm:$0xff] %v1835_v26 }
 0x851   :  { %2640 = shalt.err (!%p2637_p12)
}
 0x852   :  { %s2641_s24 = scalar_lea.hbm %s3189_s4, 128 }
 0x853   :  { %p2642_p13 = scmp.ne.s32.totalorder %s3189_s4, %s2641_s24  ;;  %p2645_p0 = scmp.lt.u32.totalorder %s2641_s24, %s3189_s4 }
 0x855   :  { %p2647_p1 = pnand %p2645_p0, %p2642_p13 }
 0x857   :  { %2650 = shalt.err (!%p2647_p1)
}
 0x858   :  { %1846 = dma.vmem_to_hbm [thread:$0]  %s1844_s20, 128, %s3189_s4, [#allocation5]  }
 0x859   :  { %2653 = dma.done.wait [#allocation5], 128  }
 0x85a   :  { %2654 = vsyncadd [#allocation5], 4294967168 }
 0x85b   :  { %1850 = vsyncpa [#allocation4], 1 }
 0x85c   :  { %1851 = vsyncpa [#allocation5], 1 }

</bundles_post_ra>
